<compile_context>
chip_gen: v7x
topology: tpu7x:2x2x1
jax: 0.10.0
libtpu: 0.0.40
codegen_flags: <defaults>
</compile_context>

<pallas_src>
import math
from functools import partial

import jax
import jax.numpy as jnp
from jax.experimental import pallas as pl
from jax.experimental.pallas import tpu as pltpu

# ---------------- small synthetic BERT config (lane-friendly dims) ----------
VOCAB = 64
MAX_POS = 16
TYPE_VOCAB = 2
HIDDEN = 128                 # multiple of 128 -> lane-dense slabs / stores
HEADS = 4
HEAD_DIM = HIDDEN // HEADS
INTER = 256                  # multiple of 128
LAYERS = 2
LN_EPS = 1e-12

BATCH = 2
SEQ = 8

NUM_VEC_ROWS = 8             # packed per-layer bias / LayerNorm vectors
VEC_W = 3 * HIDDEN           # packed row width (widest vector = bqkv)


# ------------------------------ fused kernel --------------------------------
def _encoder_kernel(emb_ref, mask_ref, emb_g_ref, emb_b_ref,
                    wqkv_ref, wo_ref, wi_ref, wo2_ref, vec_ref,
                    cls_ref, h_sc, bias_sc, *, heads):
    """grid = (BATCH, LAYERS): one grid step = (batch element, layer).

    h_sc (VMEM) carries the (S, H) hidden state across the layer axis;
    bias_sc caches the additive attention-mask bias for this batch element."""
    layer = pl.program_id(1)
    last_layer = pl.num_programs(1) - 1

    seq, hidden = h_sc.shape
    inter = wi_ref.shape[-1]
    hd = hidden // heads

    def layernorm(x, g, b):
        mu = jnp.mean(x, axis=-1, keepdims=True)
        xc = x - mu
        var = jnp.mean(xc * xc, axis=-1, keepdims=True)
        return xc * jax.lax.rsqrt(var + LN_EPS) * g + b

    # --- first layer for this batch element: embedding LN + cached mask bias
    @pl.when(layer == 0)
    def _():
        h_sc[...] = layernorm(emb_ref[...], emb_g_ref[...], emb_b_ref[...])
        bias_sc[...] = (1.0 - mask_ref[...].astype(jnp.float32)) * -10000.0

    x = h_sc[...]                                            # (S, H) f32

    # --- per-layer bias / LayerNorm vectors, one packed (8, 3H) f32 block
    vecs = vec_ref[...]
    bqkv = vecs[0:1, :]                                      # Q part pre-scaled
    bo = vecs[1:2, :hidden]
    ln1g = vecs[2:3, :hidden]
    ln1b = vecs[3:4, :hidden]
    bi = vecs[4:5, :inter]
    bo2 = vecs[5:6, :hidden]
    ln2g = vecs[6:7, :hidden]
    ln2b = vecs[7:8, :hidden]

    # --- fused QKV projection (bf16 MXU operands, f32 accumulate)
    qkv = jnp.dot(x.astype(jnp.bfloat16), wqkv_ref[...],
                  preferred_element_type=jnp.float32) + bqkv          # (S, 3H)

    # --- batched multi-head attention over all heads at once
    qh = jnp.swapaxes(qkv[:, 0:hidden].reshape(seq, heads, hd), 0, 1)      # (h,S,d)
    kh = jnp.swapaxes(qkv[:, hidden:2 * hidden].reshape(seq, heads, hd), 0, 1)
    vh = jnp.swapaxes(qkv[:, 2 * hidden:].reshape(seq, heads, hd), 0, 1)
    s = jnp.einsum('hqd,hkd->hqk',
                   qh.astype(jnp.bfloat16), kh.astype(jnp.bfloat16),
                   preferred_element_type=jnp.float32)                 # (h,S,S)
    s = s + bias_sc[...]                                               # key-axis bias
    s = s - jnp.max(s, axis=-1, keepdims=True)
    p = jnp.exp(s)
    p = p * pl.reciprocal(jnp.sum(p, axis=-1, keepdims=True), approx=True)
    ctx = jnp.einsum('hqk,hkd->hqd',
                     p.astype(jnp.bfloat16), vh.astype(jnp.bfloat16),
                     preferred_element_type=jnp.float32)               # (h,S,d)
    ctx = jnp.swapaxes(ctx, 0, 1).reshape(seq, hidden)                 # (S, H)

    # --- attention output projection + residual LayerNorm (f32)
    attn = jnp.dot(ctx.astype(jnp.bfloat16), wo_ref[...],
                   preferred_element_type=jnp.float32) + bo
    h1 = layernorm(attn + x, ln1g, ln1b)

    # --- feed-forward (GELU) + residual LayerNorm
    ff = jnp.dot(h1.astype(jnp.bfloat16), wi_ref[...],
                 preferred_element_type=jnp.float32) + bi
    # TODO(synk): HF BERT uses erf-GELU; tanh approximation used here (and in ref).
    c = math.sqrt(2.0 / math.pi)
    ff = 0.5 * ff * (1.0 + jnp.tanh(c * (ff + 0.044715 * ff * ff * ff)))
    ffn = jnp.dot(ff.astype(jnp.bfloat16), wo2_ref[...],
                  preferred_element_type=jnp.float32) + bo2
    h2 = layernorm(ffn + h1, ln2g, ln2b)

    h_sc[...] = h2

    # --- CLS row only on the final layer (dead-work removal)
    @pl.when(layer == last_layer)
    def _():
        cls_ref[...] = h2[0:1, :]


# ------------------------------ parameter init ------------------------------
def init_params(key):
    keys = jax.random.split(key, 3 + LAYERS)

    def nrm(k, shape):
        return jax.random.normal(k, shape, jnp.float32) * 0.02

    params = dict(
        word_emb=nrm(keys[0], (VOCAB, HIDDEN)),
        pos_emb=nrm(keys[1], (MAX_POS, HIDDEN)),
        type_emb=nrm(keys[2], (TYPE_VOCAB, HIDDEN)),
        emb_ln_g=jnp.ones((1, HIDDEN), jnp.float32),
        emb_ln_b=jnp.zeros((1, HIDDEN), jnp.float32),
    )
    stacks = {name: [] for name in
              ("wqkv", "bqkv", "wo", "bo", "ln1_g", "ln1_b",
               "wi", "bi", "wo2", "bo2", "ln2_g", "ln2_b")}
    for l in range(LAYERS):
        lk = jax.random.split(keys[3 + l], 4)
        stacks["wqkv"].append(nrm(lk[0], (HIDDEN, 3 * HIDDEN)))   # fused Q|K|V
        stacks["bqkv"].append(jnp.zeros((1, 3 * HIDDEN), jnp.float32))
        stacks["wo"].append(nrm(lk[1], (HIDDEN, HIDDEN)))
        stacks["bo"].append(jnp.zeros((1, HIDDEN), jnp.float32))
        stacks["ln1_g"].append(jnp.ones((1, HIDDEN), jnp.float32))
        stacks["ln1_b"].append(jnp.zeros((1, HIDDEN), jnp.float32))
        stacks["wi"].append(nrm(lk[2], (HIDDEN, INTER)))
        stacks["bi"].append(jnp.zeros((1, INTER), jnp.float32))
        stacks["wo2"].append(nrm(lk[3], (INTER, HIDDEN)))
        stacks["bo2"].append(jnp.zeros((1, HIDDEN), jnp.float32))
        stacks["ln2_g"].append(jnp.ones((1, HIDDEN), jnp.float32))
        stacks["ln2_b"].append(jnp.zeros((1, HIDDEN), jnp.float32))
    params.update({k: jnp.stack(v) for k, v in stacks.items()})
    return params


# ------------------------------ forward pass --------------------------------
def text_encoder_forward(params, input_ids, attention_mask, token_type_ids):
    B, S = input_ids.shape

    # Embedding gathers are XLA glue (no in-kernel gather needed at this size).
    we = jnp.take(params["word_emb"], input_ids, axis=0)          # (B,S,H)
    pe = params["pos_emb"][:S][None, :, :]                        # (1,S,H)
    te = jnp.take(params["type_emb"], token_type_ids, axis=0)     # (B,S,H)
    emb = (we + pe + te).reshape(B * S, HIDDEN)

    # Fold 1/sqrt(Dh) into the Q projection (weights + bias); bf16 MXU weights.
    scale = 1.0 / math.sqrt(HEAD_DIM)
    wqkv = params["wqkv"].at[:, :, :HIDDEN].multiply(scale).astype(jnp.bfloat16)
    wo = params["wo"].astype(jnp.bfloat16)
    wi = params["wi"].astype(jnp.bfloat16)
    wo2 = params["wo2"].astype(jnp.bfloat16)
    bqkv = params["bqkv"].at[:, :, :HIDDEN].multiply(scale)       # stays f32

    # Pack the 8 small per-layer vectors into one (LAYERS, 8, 3H) f32 slab
    # (one DMA per layer step instead of eight tiny ones).
    def _row(v):
        v2 = v.reshape(LAYERS, -1)
        return jnp.pad(v2, ((0, 0), (0, VEC_W - v2.shape[-1])))
    vecs = jnp.stack([_row(bqkv), _row(params["bo"]),
                      _row(params["ln1_g"]), _row(params["ln1_b"]),
                      _row(params["bi"]), _row(params["bo2"]),
                      _row(params["ln2_g"]), _row(params["ln2_b"])], axis=1)

    mask3 = attention_mask.astype(jnp.int32).reshape(B, 1, S)

    def per_layer(shape):  # shape excludes the leading LAYERS dim
        nd = len(shape)
        return pl.BlockSpec((pl.Squeezed(),) + shape,
                            lambda b, l, _nd=nd: (l,) + (0,) * _nd)

    in_specs = [
        pl.BlockSpec((SEQ, HIDDEN), lambda b, l: (b, 0)),              # emb rows of batch b
        pl.BlockSpec((pl.Squeezed(), 1, SEQ), lambda b, l: (b, 0, 0)), # mask row b
        pl.BlockSpec((1, HIDDEN), lambda b, l: (0, 0)),                # emb_ln_g
        pl.BlockSpec((1, HIDDEN), lambda b, l: (0, 0)),                # emb_ln_b
        per_layer((HIDDEN, 3 * HIDDEN)),                               # wqkv  (bf16)
        per_layer((HIDDEN, HIDDEN)),                                   # wo    (bf16)
        per_layer((HIDDEN, INTER)),                                    # wi    (bf16)
        per_layer((INTER, HIDDEN)),                                    # wo2   (bf16)
        per_layer((NUM_VEC_ROWS, VEC_W)),                              # packed vectors
    ]
    out_spec = pl.BlockSpec((pl.Squeezed(), 1, HIDDEN), lambda b, l: (b, 0, 0))

    cls = pl.pallas_call(
        partial(_encoder_kernel, heads=HEADS),
        out_shape=jax.ShapeDtypeStruct((B, 1, HIDDEN), jnp.float32),
        grid_spec=pltpu.PrefetchScalarGridSpec(
            num_scalar_prefetch=0,
            grid=(B, LAYERS),            # batch: parallel (megacore); layer: carries state
            in_specs=in_specs,
            out_specs=out_spec,
            scratch_shapes=[pltpu.VMEM((SEQ, HIDDEN), jnp.float32),    # hidden state
                            pltpu.VMEM((1, SEQ), jnp.float32)],        # mask bias
        ),
        compiler_params=pltpu.CompilerParams(
            dimension_semantics=("parallel", "arbitrary"),
            vmem_limit_bytes=32 * 1024 * 1024),  # TODO(synk): re-derive at real sizes
    )(emb, mask3, params["emb_ln_g"], params["emb_ln_b"],
      wqkv, wo, wi, wo2, vecs)
    return cls.reshape(B, HIDDEN)


# --------------------------- pure-JAX reference ------------------------------
def text_encoder_reference(params, input_ids, attention_mask, token_type_ids):
    B, S = input_ids.shape
    we = jnp.take(params["word_emb"], input_ids, axis=0)
    pe = params["pos_emb"][:S][None, :, :]
    te = jnp.take(params["type_emb"], token_type_ids, axis=0)
    x = we + pe + te

    def ln(x, g, b):
        mu = jnp.mean(x, -1, keepdims=True)
        var = jnp.mean((x - mu) ** 2, -1, keepdims=True)
        return (x - mu) * jax.lax.rsqrt(var + LN_EPS) * g + b

    h = ln(x, params["emb_ln_g"], params["emb_ln_b"])
    bias = (1.0 - attention_mask.astype(jnp.float32))[:, None, None, :] * -10000.0
    for l in range(LAYERS):
        qkv = h @ params["wqkv"][l] + params["bqkv"][l]
        q, k, v = jnp.split(qkv, 3, axis=-1)

        def heads(t):
            return t.reshape(B, S, HEADS, HEAD_DIM).transpose(0, 2, 1, 3)

        q, k, v = heads(q), heads(k), heads(v)
        s = jnp.einsum("bhqd,bhkd->bhqk", q, k) / math.sqrt(HEAD_DIM) + bias
        p = jax.nn.softmax(s, axis=-1)
        ctx = jnp.einsum("bhqk,bhkd->bhqd", p, v).transpose(0, 2, 1, 3)
        ctx = ctx.reshape(B, S, HIDDEN)
        attn = ctx @ params["wo"][l] + params["bo"][l]
        h1 = ln(attn + h, params["ln1_g"][l], params["ln1_b"][l])
        inter = h1 @ params["wi"][l] + params["bi"][l]
        c = math.sqrt(2.0 / math.pi)
        inter = 0.5 * inter * (1.0 + jnp.tanh(c * (inter + 0.044715 * inter ** 3)))
        ffn = inter @ params["wo2"][l] + params["bo2"][l]
        h = ln(ffn + h1, params["ln2_g"][l], params["ln2_b"][l])
    return h[:, 0, :]


# ----------------------------------- main ------------------------------------
if __name__ == "__main__":
    key = jax.random.PRNGKey(0)
    pkey, ikey = jax.random.split(key)
    params = init_params(pkey)

    input_ids = jax.random.randint(ikey, (BATCH, SEQ), 0, VOCAB, dtype=jnp.int32)
    # second sequence has two padding tokens at the end
    attention_mask = jnp.array(
        [[1] * SEQ, [1] * (SEQ - 2) + [0, 0]], dtype=jnp.int32)
    token_type_ids = jnp.zeros((BATCH, SEQ), dtype=jnp.int32)

    fwd = jax.jit(text_encoder_forward)
    cls = jax.block_until_ready(fwd(params, input_ids, attention_mask, token_type_ids))
    assert cls.shape == (BATCH, HIDDEN) and cls.dtype == jnp.float32

    ref = text_encoder_reference(params, input_ids, attention_mask, token_type_ids)
    max_err = float(jnp.max(jnp.abs(cls - ref)))
    # bf16 MXU operands + approx softmax reciprocal vs. an all-f32 reference.
    assert max_err < 2e-2, f"kernel/reference mismatch: {max_err}"

    print("KERNEL_OK")
</pallas_src>

<mosaic_0001>
module attributes {stable_mosaic.version = 11 : i64} {
  func.func @_encoder_kernel(%arg0: i32, %arg1: i32, %arg2: memref<8x128xf32, #tpu.memory_space<vmem>>, %arg3: memref<1x1x8xi32, #tpu.memory_space<vmem>>, %arg4: memref<1x128xf32, #tpu.memory_space<vmem>>, %arg5: memref<1x128xf32, #tpu.memory_space<vmem>>, %arg6: memref<1x128x384xbf16, #tpu.memory_space<vmem>>, %arg7: memref<1x128x128xbf16, #tpu.memory_space<vmem>>, %arg8: memref<1x128x256xbf16, #tpu.memory_space<vmem>>, %arg9: memref<1x256x128xbf16, #tpu.memory_space<vmem>>, %arg10: memref<1x8x384xf32, #tpu.memory_space<vmem>>, %arg11: memref<1x1x128xf32, #tpu.memory_space<vmem>>, %arg12: memref<8x128xf32, #tpu.memory_space<vmem>>, %arg13: memref<1x8xf32, #tpu.memory_space<vmem>>) attributes {dimension_semantics = [#tpu.dimension_semantics<parallel>, #tpu.dimension_semantics<arbitrary>], iteration_bounds = array<i64: 2, 2>, scalar_prefetch = 0 : i64, scratch_operands = 2 : i64, tpu.core_type = #tpu.core_type<tc>, window_params = [{transform_indices = @transform_0, window_bounds = array<i64: 8, 128>}, {transform_indices = @transform_1, window_bounds = array<i64: 1, 1, 8>}, {pipeline_mode = #tpu.pipeline_mode<synchronous>, transform_indices = @transform_2, window_bounds = array<i64: 1, 128>}, {pipeline_mode = #tpu.pipeline_mode<synchronous>, transform_indices = @transform_3, window_bounds = array<i64: 1, 128>}, {transform_indices = @transform_4, window_bounds = array<i64: 1, 128, 384>}, {transform_indices = @transform_5, window_bounds = array<i64: 1, 128, 128>}, {transform_indices = @transform_6, window_bounds = array<i64: 1, 128, 256>}, {transform_indices = @transform_7, window_bounds = array<i64: 1, 256, 128>}, {transform_indices = @transform_8, window_bounds = array<i64: 1, 8, 384>}, {transform_indices = @transform_9, window_bounds = array<i64: 1, 1, 128>}]} {
    %c0_i32 = arith.constant 0 : i32
    %0 = arith.cmpi eq, %arg1, %c0_i32 : i32
    %1 = arith.extui %0 : i1 to i32
    %c0_i32_0 = arith.constant 0 : i32
    %2 = arith.cmpi ne, %1, %c0_i32_0 : i32
    scf.if %2 {
      %c0_43 = arith.constant 0 : index
      %c0_44 = arith.constant 0 : index
      %128 = vector.load %arg2[%c0_43, %c0_44] : memref<8x128xf32, #tpu.memory_space<vmem>>, vector<8x128xf32>
      %c0_45 = arith.constant 0 : index
      %c0_46 = arith.constant 0 : index
      %129 = vector.load %arg4[%c0_45, %c0_46] : memref<1x128xf32, #tpu.memory_space<vmem>>, vector<1x128xf32>
      %c0_47 = arith.constant 0 : index
      %c0_48 = arith.constant 0 : index
      %130 = vector.load %arg5[%c0_47, %c0_48] : memref<1x128xf32, #tpu.memory_space<vmem>>, vector<1x128xf32>
      %cst_49 = arith.constant dense<0.000000e+00> : vector<8xf32>
      %131 = vector.multi_reduction <add>, %128, %cst_49 [1] : vector<8x128xf32> to vector<8xf32>
      %132 = vector.shape_cast %131 : vector<8xf32> to vector<8x1xf32>
      %cst_50 = arith.constant 1.280000e+02 : f32
      %133 = vector.broadcast %cst_50 : f32 to vector<8x1xf32>
      %134 = arith.divf %132, %133 : vector<8x1xf32>
      %135 = vector.broadcast %134 : vector<8x1xf32> to vector<8x128xf32>
      %136 = arith.subf %128, %135 : vector<8x128xf32>
      %137 = arith.mulf %136, %136 : vector<8x128xf32>
      %cst_51 = arith.constant dense<0.000000e+00> : vector<8xf32>
      %138 = vector.multi_reduction <add>, %137, %cst_51 [1] : vector<8x128xf32> to vector<8xf32>
      %139 = vector.shape_cast %138 : vector<8xf32> to vector<8x1xf32>
      %cst_52 = arith.constant 1.280000e+02 : f32
      %140 = vector.broadcast %cst_52 : f32 to vector<8x1xf32>
      %141 = arith.divf %139, %140 : vector<8x1xf32>
      %cst_53 = arith.constant 9.99999996E-13 : f32
      %142 = vector.broadcast %cst_53 : f32 to vector<8x1xf32>
      %143 = arith.addf %141, %142 : vector<8x1xf32>
      %144 = math.rsqrt %143 : vector<8x1xf32>
      %145 = vector.broadcast %144 : vector<8x1xf32> to vector<8x128xf32>
      %146 = arith.mulf %136, %145 : vector<8x128xf32>
      %147 = vector.broadcast %129 : vector<1x128xf32> to vector<8x128xf32>
      %148 = arith.mulf %146, %147 : vector<8x128xf32>
      %149 = vector.broadcast %130 : vector<1x128xf32> to vector<8x128xf32>
      %150 = arith.addf %148, %149 : vector<8x128xf32>
      %c0_54 = arith.constant 0 : index
      %c0_55 = arith.constant 0 : index
      %151 = vector.load %arg12[%c0_54, %c0_55] : memref<8x128xf32, #tpu.memory_space<vmem>>, vector<8x128xf32>
      tpu.vector_store %arg12[%c0_54, %c0_55], %150 {strides = array<i32>} : memref<8x128xf32, #tpu.memory_space<vmem>>, vector<8x128xf32>,
      %c0_56 = arith.constant 0 : index
      %c0_57 = arith.constant 0 : index
      %c0_58 = arith.constant 0 : index
      %152 = vector.load %arg3[%c0_56, %c0_57, %c0_58] : memref<1x1x8xi32, #tpu.memory_space<vmem>>, vector<1x1x8xi32>
      %153 = vector.shape_cast %152 : vector<1x1x8xi32> to vector<1x8xi32>
      %154 = arith.sitofp %153 : vector<1x8xi32> to vector<1x8xf32>
      %cst_59 = arith.constant 1.000000e+00 : f32
      %155 = vector.broadcast %cst_59 : f32 to vector<1x8xf32>
      %156 = arith.subf %155, %154 : vector<1x8xf32>
      %cst_60 = arith.constant -1.000000e+04 : f32
      %157 = vector.broadcast %cst_60 : f32 to vector<1x8xf32>
      %158 = arith.mulf %156, %157 : vector<1x8xf32>
      %c0_61 = arith.constant 0 : index
      %c0_62 = arith.constant 0 : index
      %159 = vector.load %arg13[%c0_61, %c0_62] : memref<1x8xf32, #tpu.memory_space<vmem>>, vector<1x8xf32>
      tpu.vector_store %arg13[%c0_61, %c0_62], %158 {strides = array<i32>} : memref<1x8xf32, #tpu.memory_space<vmem>>, vector<1x8xf32>,
    } else {
    }
    %c0 = arith.constant 0 : index
    %c0_1 = arith.constant 0 : index
    %3 = vector.load %arg12[%c0, %c0_1] : memref<8x128xf32, #tpu.memory_space<vmem>>, vector<8x128xf32>
    %c0_2 = arith.constant 0 : index
    %c0_3 = arith.constant 0 : index
    %c0_4 = arith.constant 0 : index
    %4 = vector.load %arg10[%c0_2, %c0_3, %c0_4] : memref<1x8x384xf32, #tpu.memory_space<vmem>>, vector<1x8x384xf32>
    %5 = vector.shape_cast %4 : vector<1x8x384xf32> to vector<8x384xf32>
    %6 = vector.extract_strided_slice %5 {offsets = [0, 0], sizes = [1, 384], strides = [1, 1]} : vector<8x384xf32> to vector<1x384xf32>
    %7 = vector.extract_strided_slice %5 {offsets = [1, 0], sizes = [1, 128], strides = [1, 1]} : vector<8x384xf32> to vector<1x128xf32>
    %8 = vector.extract_strided_slice %5 {offsets = [2, 0], sizes = [1, 128], strides = [1, 1]} : vector<8x384xf32> to vector<1x128xf32>
    %9 = vector.extract_strided_slice %5 {offsets = [3, 0], sizes = [1, 128], strides = [1, 1]} : vector<8x384xf32> to vector<1x128xf32>
    %10 = vector.extract_strided_slice %5 {offsets = [4, 0], sizes = [1, 256], strides = [1, 1]} : vector<8x384xf32> to vector<1x256xf32>
    %11 = vector.extract_strided_slice %5 {offsets = [5, 0], sizes = [1, 128], strides = [1, 1]} : vector<8x384xf32> to vector<1x128xf32>
    %12 = vector.extract_strided_slice %5 {offsets = [6, 0], sizes = [1, 128], strides = [1, 1]} : vector<8x384xf32> to vector<1x128xf32>
    %13 = vector.extract_strided_slice %5 {offsets = [7, 0], sizes = [1, 128], strides = [1, 1]} : vector<8x384xf32> to vector<1x128xf32>
    %14 = arith.truncf %3 : vector<8x128xf32> to vector<8x128xbf16>
    %c0_5 = arith.constant 0 : index
    %c0_6 = arith.constant 0 : index
    %c0_7 = arith.constant 0 : index
    %15 = vector.load %arg6[%c0_5, %c0_6, %c0_7] : memref<1x128x384xbf16, #tpu.memory_space<vmem>>, vector<1x128x384xbf16>
    %16 = vector.shape_cast %15 : vector<1x128x384xbf16> to vector<128x384xbf16>
    %cst = arith.constant dense<0.000000e+00> : vector<8x384xf32>
    %17 = tpu.matmul %14, %16, %cst {dimension_numbers = #tpu.dot_dimension_numbers<[1], [0], [0], [1], [0, 0, 1, 1], [], []>} : vector<8x128xbf16>, vector<128x384xbf16>, vector<8x384xf32> -> vector<8x384xf32>
    %18 = vector.broadcast %6 : vector<1x384xf32> to vector<8x384xf32>
    %19 = arith.addf %17, %18 : vector<8x384xf32>
    %20 = vector.extract_strided_slice %19 {offsets = [0, 0], sizes = [8, 128], strides = [1, 1]} : vector<8x384xf32> to vector<8x128xf32>
    %21 = vector.shape_cast %20 : vector<8x128xf32> to vector<8x4x32xf32>
    %22 = tpu.transpose %21, [1, 0, 2] : vector<8x4x32xf32> -> vector<4x8x32xf32>
    %23 = vector.extract_strided_slice %19 {offsets = [0, 128], sizes = [8, 128], strides = [1, 1]} : vector<8x384xf32> to vector<8x128xf32>
    %24 = vector.shape_cast %23 : vector<8x128xf32> to vector<8x4x32xf32>
    %25 = tpu.transpose %24, [1, 0, 2] : vector<8x4x32xf32> -> vector<4x8x32xf32>
    %26 = vector.extract_strided_slice %19 {offsets = [0, 256], sizes = [8, 128], strides = [1, 1]} : vector<8x384xf32> to vector<8x128xf32>
    %27 = vector.shape_cast %26 : vector<8x128xf32> to vector<8x4x32xf32>
    %28 = tpu.transpose %27, [1, 0, 2] : vector<8x4x32xf32> -> vector<4x8x32xf32>
    %29 = arith.truncf %22 : vector<4x8x32xf32> to vector<4x8x32xbf16>
    %30 = arith.truncf %25 : vector<4x8x32xf32> to vector<4x8x32xbf16>
    "tpu.trace_start"() <{level = 10 : i32, message = "hqd,hkd->hqk"}> : () -> ()
    %cst_8 = arith.constant dense<0.000000e+00> : vector<4x8x8xf32>
    %31 = tpu.matmul %29, %30, %cst_8 {dimension_numbers = #tpu.dot_dimension_numbers<[2], [2], [1], [1], [0, 0, 0, 1, 1, 1], [0], [0]>} : vector<4x8x32xbf16>, vector<4x8x32xbf16>, vector<4x8x8xf32> -> vector<4x8x8xf32>
    "tpu.trace_stop"() : () -> ()
    %c0_9 = arith.constant 0 : index
    %c0_10 = arith.constant 0 : index
    %32 = vector.load %arg13[%c0_9, %c0_10] : memref<1x8xf32, #tpu.memory_space<vmem>>, vector<1x8xf32>
    %33 = vector.shape_cast %32 : vector<1x8xf32> to vector<1x1x8xf32>
    %34 = vector.broadcast %33 : vector<1x1x8xf32> to vector<4x8x8xf32>
    %35 = arith.addf %31, %34 : vector<4x8x8xf32>
    %cst_11 = arith.constant dense<0xFF800000> : vector<4x8xf32>
    %36 = vector.multi_reduction <maximumf>, %35, %cst_11 [2] : vector<4x8x8xf32> to vector<4x8xf32>
    %37 = vector.shape_cast %36 : vector<4x8xf32> to vector<4x8x1xf32>
    %38 = vector.broadcast %37 : vector<4x8x1xf32> to vector<4x8x8xf32>
    %39 = arith.subf %35, %38 : vector<4x8x8xf32>
    %40 = math.exp %39 : vector<4x8x8xf32>
    %cst_12 = arith.constant dense<0.000000e+00> : vector<4x8xf32>
    %41 = vector.multi_reduction <add>, %40, %cst_12 [2] : vector<4x8x8xf32> to vector<4x8xf32>
    %42 = vector.shape_cast %41 : vector<4x8xf32> to vector<4x8x1xf32>
    %43 = tpu.reciprocal %42 {approx = true} : vector<4x8x1xf32> -> vector<4x8x1xf32>
    %44 = vector.broadcast %43 : vector<4x8x1xf32> to vector<4x8x8xf32>
    %45 = arith.mulf %40, %44 : vector<4x8x8xf32>
    %46 = arith.truncf %45 : vector<4x8x8xf32> to vector<4x8x8xbf16>
    %47 = arith.truncf %28 : vector<4x8x32xf32> to vector<4x8x32xbf16>
    "tpu.trace_start"() <{level = 10 : i32, message = "hqk,hkd->hqd"}> : () -> ()
    %cst_13 = arith.constant dense<0.000000e+00> : vector<4x8x32xf32>
    %48 = tpu.matmul %46, %47, %cst_13 {dimension_numbers = #tpu.dot_dimension_numbers<[2], [1], [1], [2], [0, 0, 0, 1, 1, 2], [0], [0]>} : vector<4x8x8xbf16>, vector<4x8x32xbf16>, vector<4x8x32xf32> -> vector<4x8x32xf32>
    "tpu.trace_stop"() : () -> ()
    %49 = tpu.transpose %48, [1, 0, 2] : vector<4x8x32xf32> -> vector<8x4x32xf32>
    %50 = vector.shape_cast %49 : vector<8x4x32xf32> to vector<8x128xf32>
    %51 = arith.truncf %50 : vector<8x128xf32> to vector<8x128xbf16>
    %c0_14 = arith.constant 0 : index
    %c0_15 = arith.constant 0 : index
    %c0_16 = arith.constant 0 : index
    %52 = vector.load %arg7[%c0_14, %c0_15, %c0_16] : memref<1x128x128xbf16, #tpu.memory_space<vmem>>, vector<1x128x128xbf16>
    %53 = vector.shape_cast %52 : vector<1x128x128xbf16> to vector<128x128xbf16>
    %cst_17 = arith.constant dense<0.000000e+00> : vector<8x128xf32>
    %54 = tpu.matmul %51, %53, %cst_17 {dimension_numbers = #tpu.dot_dimension_numbers<[1], [0], [0], [1], [0, 0, 1, 1], [], []>} : vector<8x128xbf16>, vector<128x128xbf16>, vector<8x128xf32> -> vector<8x128xf32>
    %55 = vector.broadcast %7 : vector<1x128xf32> to vector<8x128xf32>
    %56 = arith.addf %54, %55 : vector<8x128xf32>
    %57 = arith.addf %56, %3 : vector<8x128xf32>
    %cst_18 = arith.constant dense<0.000000e+00> : vector<8xf32>
    %58 = vector.multi_reduction <add>, %57, %cst_18 [1] : vector<8x128xf32> to vector<8xf32>
    %59 = vector.shape_cast %58 : vector<8xf32> to vector<8x1xf32>
    %cst_19 = arith.constant 1.280000e+02 : f32
    %60 = vector.broadcast %cst_19 : f32 to vector<8x1xf32>
    %61 = arith.divf %59, %60 : vector<8x1xf32>
    %62 = vector.broadcast %61 : vector<8x1xf32> to vector<8x128xf32>
    %63 = arith.subf %57, %62 : vector<8x128xf32>
    %64 = arith.mulf %63, %63 : vector<8x128xf32>
    %cst_20 = arith.constant dense<0.000000e+00> : vector<8xf32>
    %65 = vector.multi_reduction <add>, %64, %cst_20 [1] : vector<8x128xf32> to vector<8xf32>
    %66 = vector.shape_cast %65 : vector<8xf32> to vector<8x1xf32>
    %cst_21 = arith.constant 1.280000e+02 : f32
    %67 = vector.broadcast %cst_21 : f32 to vector<8x1xf32>
    %68 = arith.divf %66, %67 : vector<8x1xf32>
    %cst_22 = arith.constant 9.99999996E-13 : f32
    %69 = vector.broadcast %cst_22 : f32 to vector<8x1xf32>
    %70 = arith.addf %68, %69 : vector<8x1xf32>
    %71 = math.rsqrt %70 : vector<8x1xf32>
    %72 = vector.broadcast %71 : vector<8x1xf32> to vector<8x128xf32>
    %73 = arith.mulf %63, %72 : vector<8x128xf32>
    %74 = vector.broadcast %8 : vector<1x128xf32> to vector<8x128xf32>
    %75 = arith.mulf %73, %74 : vector<8x128xf32>
    %76 = vector.broadcast %9 : vector<1x128xf32> to vector<8x128xf32>
    %77 = arith.addf %75, %76 : vector<8x128xf32>
    %78 = arith.truncf %77 : vector<8x128xf32> to vector<8x128xbf16>
    %c0_23 = arith.constant 0 : index
    %c0_24 = arith.constant 0 : index
    %c0_25 = arith.constant 0 : index
    %79 = vector.load %arg8[%c0_23, %c0_24, %c0_25] : memref<1x128x256xbf16, #tpu.memory_space<vmem>>, vector<1x128x256xbf16>
    %80 = vector.shape_cast %79 : vector<1x128x256xbf16> to vector<128x256xbf16>
    %cst_26 = arith.constant dense<0.000000e+00> : vector<8x256xf32>
    %81 = tpu.matmul %78, %80, %cst_26 {dimension_numbers = #tpu.dot_dimension_numbers<[1], [0], [0], [1], [0, 0, 1, 1], [], []>} : vector<8x128xbf16>, vector<128x256xbf16>, vector<8x256xf32> -> vector<8x256xf32>
    %82 = vector.broadcast %10 : vector<1x256xf32> to vector<8x256xf32>
    %83 = arith.addf %81, %82 : vector<8x256xf32>
    %cst_27 = arith.constant 5.000000e-01 : f32
    %84 = vector.broadcast %cst_27 : f32 to vector<8x256xf32>
    %85 = arith.mulf %84, %83 : vector<8x256xf32>
    %cst_28 = arith.constant 4.471500e-02 : f32
    %86 = vector.broadcast %cst_28 : f32 to vector<8x256xf32>
    %87 = arith.mulf %86, %83 : vector<8x256xf32>
    %88 = arith.mulf %87, %83 : vector<8x256xf32>
    %89 = arith.mulf %88, %83 : vector<8x256xf32>
    %90 = arith.addf %83, %89 : vector<8x256xf32>
    %cst_29 = arith.constant 0.797884583 : f32
    %91 = vector.broadcast %cst_29 : f32 to vector<8x256xf32>
    %92 = arith.mulf %91, %90 : vector<8x256xf32>
    %93 = math.tanh %92 : vector<8x256xf32>
    %cst_30 = arith.constant 1.000000e+00 : f32
    %94 = vector.broadcast %cst_30 : f32 to vector<8x256xf32>
    %95 = arith.addf %94, %93 : vector<8x256xf32>
    %96 = arith.mulf %85, %95 : vector<8x256xf32>
    %97 = arith.truncf %96 : vector<8x256xf32> to vector<8x256xbf16>
    %c0_31 = arith.constant 0 : index
    %c0_32 = arith.constant 0 : index
    %c0_33 = arith.constant 0 : index
    %98 = vector.load %arg9[%c0_31, %c0_32, %c0_33] : memref<1x256x128xbf16, #tpu.memory_space<vmem>>, vector<1x256x128xbf16>
    %99 = vector.shape_cast %98 : vector<1x256x128xbf16> to vector<256x128xbf16>
    %cst_34 = arith.constant dense<0.000000e+00> : vector<8x128xf32>
    %100 = tpu.matmul %97, %99, %cst_34 {dimension_numbers = #tpu.dot_dimension_numbers<[1], [0], [0], [1], [0, 0, 1, 1], [], []>} : vector<8x256xbf16>, vector<256x128xbf16>, vector<8x128xf32> -> vector<8x128xf32>
    %101 = vector.broadcast %11 : vector<1x128xf32> to vector<8x128xf32>
    %102 = arith.addf %100, %101 : vector<8x128xf32>
    %103 = arith.addf %102, %77 : vector<8x128xf32>
    %cst_35 = arith.constant dense<0.000000e+00> : vector<8xf32>
    %104 = vector.multi_reduction <add>, %103, %cst_35 [1] : vector<8x128xf32> to vector<8xf32>
    %105 = vector.shape_cast %104 : vector<8xf32> to vector<8x1xf32>
    %cst_36 = arith.constant 1.280000e+02 : f32
    %106 = vector.broadcast %cst_36 : f32 to vector<8x1xf32>
    %107 = arith.divf %105, %106 : vector<8x1xf32>
    %108 = vector.broadcast %107 : vector<8x1xf32> to vector<8x128xf32>
    %109 = arith.subf %103, %108 : vector<8x128xf32>
    %110 = arith.mulf %109, %109 : vector<8x128xf32>
    %cst_37 = arith.constant dense<0.000000e+00> : vector<8xf32>
    %111 = vector.multi_reduction <add>, %110, %cst_37 [1] : vector<8x128xf32> to vector<8xf32>
    %112 = vector.shape_cast %111 : vector<8xf32> to vector<8x1xf32>
    %cst_38 = arith.constant 1.280000e+02 : f32
    %113 = vector.broadcast %cst_38 : f32 to vector<8x1xf32>
    %114 = arith.divf %112, %113 : vector<8x1xf32>
    %cst_39 = arith.constant 9.99999996E-13 : f32
    %115 = vector.broadcast %cst_39 : f32 to vector<8x1xf32>
    %116 = arith.addf %114, %115 : vector<8x1xf32>
    %117 = math.rsqrt %116 : vector<8x1xf32>
    %118 = vector.broadcast %117 : vector<8x1xf32> to vector<8x128xf32>
    %119 = arith.mulf %109, %118 : vector<8x128xf32>
    %120 = vector.broadcast %12 : vector<1x128xf32> to vector<8x128xf32>
    %121 = arith.mulf %119, %120 : vector<8x128xf32>
    %122 = vector.broadcast %13 : vector<1x128xf32> to vector<8x128xf32>
    %123 = arith.addf %121, %122 : vector<8x128xf32>
    %c0_40 = arith.constant 0 : index
    %c0_41 = arith.constant 0 : index
    %124 = vector.load %arg12[%c0_40, %c0_41] : memref<8x128xf32, #tpu.memory_space<vmem>>, vector<8x128xf32>
    tpu.vector_store %arg12[%c0_40, %c0_41], %123 {strides = array<i32>} : memref<8x128xf32, #tpu.memory_space<vmem>>, vector<8x128xf32>,
    %c1_i32 = arith.constant 1 : i32
    %125 = arith.cmpi eq, %arg1, %c1_i32 : i32
    %126 = arith.extui %125 : i1 to i32
    %c0_i32_42 = arith.constant 0 : i32
    %127 = arith.cmpi ne, %126, %c0_i32_42 : i32
    scf.if %127 {
      %128 = vector.extract_strided_slice %123 {offsets = [0, 0], sizes = [1, 128], strides = [1, 1]} : vector<8x128xf32> to vector<1x128xf32>
      %c0_43 = arith.constant 0 : index
      %c0_44 = arith.constant 0 : index
      %c0_45 = arith.constant 0 : index
      %129 = vector.load %arg11[%c0_43, %c0_44, %c0_45] : memref<1x1x128xf32, #tpu.memory_space<vmem>>, vector<1x1x128xf32>
      %130 = vector.shape_cast %129 : vector<1x1x128xf32> to vector<1x128xf32>
      %131 = vector.shape_cast %128 : vector<1x128xf32> to vector<1x1x128xf32>
      tpu.vector_store %arg11[%c0_43, %c0_44, %c0_45], %131 {strides = array<i32>} : memref<1x1x128xf32, #tpu.memory_space<vmem>>, vector<1x1x128xf32>,
    } else {
    }
    return
  }
  func.func @transform_0(%arg0: i32, %arg1: i32) -> (i32, i32) {
    %c0_i32 = arith.constant 0 : i32
    %c0_i32_0 = arith.constant 0 : i32
    return %arg0, %c0_i32 : i32, i32
  }
  func.func @transform_1(%arg0: i32, %arg1: i32) -> (i32, i32, i32) {
    %c0_i32 = arith.constant 0 : i32
    %c0_i32_0 = arith.constant 0 : i32
    %c0_i32_1 = arith.constant 0 : i32
    return %arg0, %c0_i32, %c0_i32_0 : i32, i32, i32
  }
  func.func @transform_2(%arg0: i32, %arg1: i32) -> (i32, i32) {
    %c0_i32 = arith.constant 0 : i32
    %c0_i32_0 = arith.constant 0 : i32
    %c0_i32_1 = arith.constant 0 : i32
    return %c0_i32, %c0_i32_0 : i32, i32
  }
  func.func @transform_3(%arg0: i32, %arg1: i32) -> (i32, i32) {
    %c0_i32 = arith.constant 0 : i32
    %c0_i32_0 = arith.constant 0 : i32
    %c0_i32_1 = arith.constant 0 : i32
    return %c0_i32, %c0_i32_0 : i32, i32
  }
  func.func @transform_4(%arg0: i32, %arg1: i32) -> (i32, i32, i32) {
    %c0_i32 = arith.constant 0 : i32
    %c0_i32_0 = arith.constant 0 : i32
    %c0_i32_1 = arith.constant 0 : i32
    return %arg1, %c0_i32, %c0_i32_0 : i32, i32, i32
  }
  func.func @transform_5(%arg0: i32, %arg1: i32) -> (i32, i32, i32) {
    %c0_i32 = arith.constant 0 : i32
    %c0_i32_0 = arith.constant 0 : i32
    %c0_i32_1 = arith.constant 0 : i32
    return %arg1, %c0_i32, %c0_i32_0 : i32, i32, i32
  }
  func.func @transform_6(%arg0: i32, %arg1: i32) -> (i32, i32, i32) {
    %c0_i32 = arith.constant 0 : i32
    %c0_i32_0 = arith.constant 0 : i32
    %c0_i32_1 = arith.constant 0 : i32
    return %arg1, %c0_i32, %c0_i32_0 : i32, i32, i32
  }
  func.func @transform_7(%arg0: i32, %arg1: i32) -> (i32, i32, i32) {
    %c0_i32 = arith.constant 0 : i32
    %c0_i32_0 = arith.constant 0 : i32
    %c0_i32_1 = arith.constant 0 : i32
    return %arg1, %c0_i32, %c0_i32_0 : i32, i32, i32
  }
  func.func @transform_8(%arg0: i32, %arg1: i32) -> (i32, i32, i32) {
    %c0_i32 = arith.constant 0 : i32
    %c0_i32_0 = arith.constant 0 : i32
    %c0_i32_1 = arith.constant 0 : i32
    return %arg1, %c0_i32, %c0_i32_0 : i32, i32, i32
  }
  func.func @transform_9(%arg0: i32, %arg1: i32) -> (i32, i32, i32) {
    %c0_i32 = arith.constant 0 : i32
    %c0_i32_0 = arith.constant 0 : i32
    %c0_i32_1 = arith.constant 0 : i32
    return %arg0, %c0_i32, %c0_i32_0 : i32, i32, i32
  }
}

</mosaic_0001>

<bundles_post_ra>
// kernel: text_encoder_forward.1
= control target key start
LH: loop header
LB: loop body
LE: loop exit
PB: predicated region body
PF: predicated region fallthrough
CT: control target
= control target key end

     0   :  { %s3465_s0 = inlined_call_operand.vmem [shape: f32[16,128], index: 0, kind: input, shape index: {}]   ;;  %s3466_s1 = inlined_call_operand.vmem [shape: s32[2,1,8], index: 1, kind: input, shape index: {}]   ;;  %s3467_s2 = inlined_call_operand.vmem [shape: f32[1,128], index: 2, kind: input, shape index: {}]   ;;  %s3468_s3 = inlined_call_operand.vmem [shape: f32[1,128], index: 3, kind: input, shape index: {}]   ;;  %s3469_s4 = inlined_call_operand.vmem [shape: bf16[2,128,384], index: 4, kind: input, shape index: {}]   ;;  %s3470_s5 = inlined_call_operand.vmem [shape: bf16[2,128,128], index: 5, kind: input, shape index: {}]   ;;  %s3471_s6 = inlined_call_operand.vmem [shape: bf16[2,128,256], index: 6, kind: input, shape index: {}]   ;;  %s3472_s7 = inlined_call_operand.vmem [shape: bf16[2,256,128], index: 7, kind: input, shape index: {}]   ;;  %s3473_s8 = inlined_call_operand.vmem [shape: f32[2,8,384], index: 8, kind: input, shape index: {}]   ;;  %s3474_s9 = inlined_call_operand.hbm [shape: f32[2,1,128], index: 9, kind: output, shape index: {}]  }
   0x1   :  { %3486 = sst [smem:[#allocation17_spill]] %s3465_s0 }
   0x2   :  { %3487 = sst [smem:[#allocation18_spill]] %s3474_s9 }
   0x3   :  { %14 = vsyncpa [#allocation5], 0 }
   0x4   :  { %16 = vsyncpa [#allocation5 + $0x1], 0  ;;  %s3019_s30 = smov 0   ;;  %s3021_s10 = smov 0  }
   0x5   :  { %s3023_s11 = smov 0   ;;  %s3025_s12 = smov 0  }
   0x6   :  { %s3027_s13 = smov 0   ;;  %s3029_s14 = smov 0  }
   0x7   :  { %s3031_s15 = smov 0   ;;  %s3033_s16 = smov 0  }
   0x8 LB: > { %3488 = sst [smem:[#allocation7_spill]] %s2930_s30  ;;  %s2427_s17 = sadd.s32 4294967295, %s2958_s16   ;;  %s2958_s16 = sphi %s3033_s16, %s22_s16   ;;  %s2954_s15 = sphi %s3031_s15, %s3513_s15   ;;  %s2950_s14 = sphi %s3029_s14, %s3512_s14   ;;  %s2946_s13 = sphi %s3027_s13, %s3511_s13   ;;  %s2942_s12 = sphi %s3025_s12, %s3510_s12   ;;  %s2938_s11 = sphi %s3023_s11, %s3509_s11   ;;  %s2934_s10 = sphi %s3021_s10, %s3515_s10   ;;  %s2930_s30 = sphi %s3019_s30, %s3514_s30  }
   0x9   : > { %3489 = sst [smem:[#allocation8_spill]] %s2938_s11  ;;  %s2428_s18 = sadd.s32 4294967294, %s2958_s16  }
   0xa   : > { %3490 = sst [smem:[#allocation9_spill]] %s2950_s14  ;;  %s31_s19 = sadd.s32 1, %s2950_s14 }
   0xb   : > { %3491 = sst [smem:[#allocation10_spill]] %s2954_s15  ;;  %p32_p0 = scmp.ge.s32.totalorder %s31_s19, 2 }
   0xc   : > { %3492 = sst [smem:[#allocation11_spill]] %s2958_s16  ;;  %s34_s20 = sadd.s32 1, %s2954_s15 }
   0xd   : > { %p275_p1 = scmp.ne.s32.totalorder %s2938_s11, %s2934_s10  ;;  %p276_p2 = scmp.eq.s32.totalorder %s2427_s17, 3 }
   0xe   : > { %s3517_s19 = smov (%p32_p0, %s31_s19), 0  ;;  %s3519_s20 = smov (!%p32_p0, %s34_s20), %s2954_s15 }
   0xf   : > { %3493 = sst [smem:[#allocation12_spill]] %s3517_s19  ;;  %p3068_p3 = por %p276_p2, %p275_p1 }
  0x10   : > { %p281_p4 = scmp.ne.s32.totalorder %s2934_s10, %s2930_s30  ;;  %p36_p5 = scmp.ge.s32.totalorder %s3519_s20, 2 }
  0x11   : > { %s3494_s21 = scalar_select %p3068_p3, 1, 0 }
  0x12   : > { %p282_p6 = scmp.eq.s32.totalorder %s2428_s18, 3  ;;  %p2431_p7 = scmp.ge.s32.totalorder %s2958_s16, 1 }
  0x13   : > { %3495 = sst [smem:[#allocation13_spill]] %s3494_s21  ;;  %p359_p8 = scmp.lt.s32.totalorder %s2958_s16, 5 }
  0x14   : > { %s3521_s20 = smov (%p36_p5, %s3519_s20), 0  ;;  %p3078_p9 = por %p282_p6, %p281_p4 }
  0x15   : > { %3496 = sst [smem:[#allocation14_spill]] %s3521_s20  ;;  %p360_p10 = pnand %p2431_p7, %p359_p8 }
  0x16   : > { %s3497_s22 = scalar_select %p3078_p9, 1, 0 }
  0x17   : > { %s262_s23 = ssub.s32 %s2954_s15, %s3521_s20  ;;  %s265_s24 = sadd.s32 1, %s2938_s11 }
  0x18   : > { %3498 = sst [smem:[#allocation15_spill]] %s3497_s22  ;;  %p263_p11 = scmp.eq.s32.totalorder %s262_s23, 0 }
  0x19   : > { %363 = sbr.rel (%p360_p10) target bundleno = 3016 (0xbc8), region = 56  ;;  %p421_p12 = scmp.lt.s32.totalorder (!%p360_p10), %s2946_s13, 1 }
  0x1a   : > { %s3086_s25 = scalar_select %p263_p11, %s2938_s11, %s265_s24  }
  0x1b   : > { %p428_p13 = scmp.lt.s32.totalorder (!%p360_p10), %s2942_s12, 1  ;;  %s3500_s0 = sld [smem:[#allocation17_spill]] (!%p360_p10) }
  0x1c   : > { %3499 = sst [smem:[#allocation16_spill]] %s3086_s25  ;;  %s3501_s22 = sand.u32 (!%p360_p10), 1, %s2934_s10  }
  0x1d   : > { %s3126_s30 = scalar_lea.vmem (!%p360_p10), [#allocation4], %s3501_s22  ;;  %p2441_p0 = scmp.ne.s32.totalorder (!%p360_p10), %s2942_s12, 0 }
  0x20   : > { %s422_s27 = scalar_select %p421_p12, %s2946_s13, 1 }
  0x21   : > { %s429_s28 = scalar_select %p428_p13, %s2942_s12, 1 }
  0x22   : > { %s2432_s29 = sshll.u32 %s422_s27, 3  ;;  %s427_s20 = scalar_lea.vmem %s3466_s1, %s422_s27  ;;  %vm492_vm0 = vcmask (!%p2441_p0), 57344   ;;  %v2442_v13 = vld [vmem:[%s3467_s2] ss:$0 sm:$0xff] (!%p2441_p0) }
  0x23   : > { %s424_s19 = scalar_lea.vmem %s3500_s0, %s2432_s29  ;;  %s2676_s15 = smul.u32 192, %s429_s28  ;;  %v488_v5 = vld [vmem:[%s427_s20] sm:$0x1] (!%p2441_p0) }
  0x24   : > { %s2529_s14 = sshll.u32 %s429_s28, 6  ;;  %s2530_s25 = sshll.u32 %s429_s28, 7  ;;  %v458_v0 = vld [vmem:[%s424_s19] sm:$0xff] (!%p2441_p0)  ;;  %v489_v6 = vcvt.s32.f32 (!%p2441_p0), %v488_v5 }
  0x25   : > { %s3102_s26 = scalar_lea.vmem %s3469_s4, %s2676_s15  ;;  %s3107_s9 = scalar_lea.vmem %s3470_s5, %s2529_s14  ;;  %461 = vadd.xlane.f32.xlu0 (!%p2441_p0), %v458_v0  ;;  %v2443_v15 = vld [vmem:[%s3468_s3] ss:$0 sm:$0xff] (!%p2441_p0) }
  0x26   : > { %s3112_s27 = scalar_lea.vmem %s3471_s6, %s2530_s25  ;;  %s3117_s23 = scalar_lea.vmem %s3472_s7, %s2530_s25  ;;  %v490_v7 = vsub.f32 (!%p2441_p0), 1.0, %v489_v6 }
  0x27   : > { %s2677_s24 = smul.u32 24, %s429_s28 }
  0x28   : > { %457 = sbr.rel (%p2441_p0) target bundleno = 349 (0x15d), region = 60  ;;  %v491_v8 = vmul.f32 (!%p2441_p0), -10000.0, %v490_v7 }
  0x29   : > { %s3122_s15 = scalar_lea.vmem %s3473_s8, %s2677_s24 }
  0x2a   : > { %493 = vst.msk [vmem:[#allocation3] sm:$0x1] (!%p2441_p0), %vm492_vm0, %v491_v8 }
  0xb2   : > { %v462_v1 = vpop.xlane.xlu0 %461 }
  0xb3   : > { %v464_v2 = vmul.f32 0.0078125, %v462_v1 }
  0xb5   : > { %v465_v3 = vsub.f32 %v458_v0, %v464_v2 }
  0xb7   : > { %v466_v4 = vmul.f32 %v465_v3, %v465_v3 }
  0xb9   : > { %467 = vadd.xlane.f32.xlu0 %v466_v4 }
 0x146   : > { %v468_v9 = vpop.xlane.xlu0 %467 }
 0x147   : > { %v469_v10 = vmul.f32 0.0078125, %v468_v9 }
 0x149   : > { %v470_v11 = vadd.f32 1e-12, %v469_v10 }
 0x14b   : > { %2757 = vrsqrt.f32 %v470_v11 }
 0x155   : > { %v2758_v12 = vpop.eup %2757 }
 0x156   : > { %v472_v14 = vmul.f32 %v2758_v12, %v465_v3 }
 0x158   : > { %v479_v16 = vmul.f32 %v2442_v13, %v472_v14 }
 0x15a   : > { %v486_v17 = vadd.f32 %v2443_v15, %v479_v16 }
 0x15c   : > { %487 = vst [vmem:[#allocation2] sm:$0xff] %v486_v17 }
 0x15d PF: > { %v2759_v18 = vld [vmem:[%s3102_s26 + $0x4] ss:$12 sps:$4 sm:$0xff]   ;;  %v2761_v19 = vld [vmem:[%s3102_s26] ss:$12 sps:$4 sm:$0xff]   ;;  %v2960_v20 = vmov 0   ;;  %v2961_v38 = vmov 0.0   ;;  %v531_v41 = vlaneseq }
 0x15e   : > { %703 = vmatprep.mubr.bf16.mxu0 %v2960_v20  ;;  %671 = vmatprep.subr.bf16.mxu0 %v2759_v18  ;;  %v2762_v21 = vld [vmem:[%s3102_s26 + $0x1c] ss:$12 sps:$4 sm:$0xff]   ;;  %v2764_v22 = vld [vmem:[%s3102_s26 + $0x18] ss:$12 sps:$4 sm:$0xff]   ;;  %v2765_v23 = vld [vmem:[%s3102_s26 + $0x34] ss:$12 sps:$4 sm:$0xff]  }
 0x15f   : > { %672 = vmatpush1.bf16.msra.mxu0 %v2761_v19  ;;  %v2767_v24 = vld [vmem:[%s3102_s26 + $0x30] ss:$12 sps:$4 sm:$0xff]   ;;  %v2768_v25 = vld [vmem:[%s3102_s26 + $0x4c] ss:$12 sps:$4 sm:$0xff]   ;;  %v2770_v26 = vld [vmem:[%s3102_s26 + $0x48] ss:$12 sps:$4 sm:$0xff]   ;;  %2588 = vmatprep.subr.bf16.mxu1 %v2961_v38 }
 0x160   : > { %673 = vmatprep.subr.bf16.mxu0 %v2762_v21  ;;  %v2771_v27 = vld [vmem:[%s3102_s26 + $0x64] ss:$12 sps:$4 sm:$0xff]   ;;  %v2773_v28 = vld [vmem:[%s3102_s26 + $0x60] ss:$12 sps:$4 sm:$0xff]   ;;  %v2774_v29 = vld [vmem:[%s3102_s26 + $0x7c] ss:$12 sps:$4 sm:$0xff]  }
 0x161   : > { %v2776_v30 = vld [vmem:[%s3102_s26 + $0x78] ss:$12 sps:$4 sm:$0xff]   ;;  %v2777_v31 = vld [vmem:[%s3102_s26 + $0x94] ss:$12 sps:$4 sm:$0xff]   ;;  %v2779_v32 = vld [vmem:[%s3102_s26 + $0x90] ss:$12 sps:$4 sm:$0xff]  }
 0x162   : > { %v2780_v33 = vld [vmem:[%s3102_s26 + $0xac] ss:$12 sps:$4 sm:$0xff]   ;;  %v2782_v34 = vld [vmem:[%s3102_s26 + $0xa8] ss:$12 sps:$4 sm:$0xff]   ;;  %v2786_v42 = vld [vmem:[%s3102_s26 + $0x50] ss:$12 sps:$4 sm:$0xff]  }
 0x163   : > { %674 = vmatpush1.bf16.msra.mxu0 %v2764_v22  ;;  %v3152_v35 = vld [vmem:[#allocation2] sm:$0xff]  ;;  %v2783_v37 = vld [vmem:[%s3102_s26 + $0x8] ss:$12 sps:$4 sm:$0xff]   ;;  %v3165_v43 = vshrl.u32 %v531_v41, 7  ;;  %s2962_s20 = smov 32   ;;  %s2963_s21 = smov 96  }
 0x164   : > { %675 = vmatprep.subr.bf16.mxu0 %v2765_v23  ;;  %v498_v36 = vpack.c.bf16 %v3152_v35, %v3152_v35  ;;  %2589 = vmatpush3.bf16.msra.mxu1 %v2783_v37  ;;  %v2784_v39 = vld [vmem:[%s3102_s26 + $0x20] ss:$12 sps:$4 sm:$0xff]   ;;  %v2785_v40 = vld [vmem:[%s3102_s26 + $0x38] ss:$12 sps:$4 sm:$0xff]   ;;  %v2787_v44 = vld [vmem:[%s3102_s26 + $0x68] ss:$12 sps:$4 sm:$0xff]  }
 0x165   : > { %2590 = vmatprep.subr.bf16.mxu1 %v2961_v38  ;;  %v3170_v45 = vsub.s32 0, %v3165_v43  ;;  %v3173_v46 = vld [vmem:[%s3122_s15 + $0x8] sm:$0xff]  ;;  %v3180_v49 = vld [vmem:[%s3122_s15] sm:$0xff]  ;;  %v2790_v58 = vld [vmem:[%s3102_s26 + $0xb0] ss:$12 sps:$4 sm:$0xff]   ;;  %s2964_s25 = smov 64  }
 0x166   : > { %v2788_v48 = vld [vmem:[%s3102_s26 + $0x80] ss:$12 sps:$4 sm:$0xff]   ;;  %v2789_v55 = vld [vmem:[%s3102_s26 + $0x98] ss:$12 sps:$4 sm:$0xff]   ;;  %vm2965_vm1 = vmmov 0   ;;  %vm1205_vm2 = vcmask 261120  }
 0x167   : > { %676 = vmatpush1.bf16.msra.mxu0 %v2767_v24  ;;  %v538_v47 = vrot.slane %v3173_v46, %v3170_v45  ;;  %v534_v52 = vrot.slane %v3180_v49, %v3170_v45  ;;  %2604 = vmatprep.mubr.msk.bf16.mxu1 %vm2965_vm1, %v2961_v38  ;;  %v2966_v59 = vmov 1983009808   ;;  %v2967_v61 = vmov 1934713408   ;;  %p2525_p1 = scmp.ne.s32.totalorder %s2942_s12, 1 }
 0x168   : > { %677 = vmatprep.subr.bf16.mxu0 %v2768_v25  ;;  %2591 = vmatpush3.bf16.msra.mxu1 %v2784_v39  ;;  %v765_v60 = vunpack.c.l.s4 %v2966_v59  ;;  %v797_v62 = vunpack.c.l.s4 %v2967_v61  ;;  %vm1390_vm3 = vcmask 64512   ;;  %vm1446_vm4 = vcmask 1043456  }
 0x169   : > { %2592 = vmatprep.subr.bf16.mxu1 %v2961_v38  ;;  %vm1777_vm5 = vcmask 523264   ;;  %vm1779_vm6 = vcmask 785408  }
 0x16a   : > { %v766_v63 = vunpack.c.0.s8 %v765_v60  ;;  %v798_v2 = vunpack.c.0.s8 %v797_v62 }
 0x16b   : > { %678 = vmatpush1.bf16.msra.mxu0 %v2770_v26 }
 0x16c   : > { %679 = vmatprep.subr.bf16.mxu0 %v2771_v27  ;;  %2593 = vmatpush3.bf16.msra.mxu1 %v2785_v40  ;;  %v3202_v3 = vsub.s32 %v766_v63, %v3165_v43  ;;  %v3205_v10 = vsub.s32 %v798_v2, %v3165_v43 }
 0x16d   : > { %2594 = vmatprep.subr.bf16.mxu1 %v2961_v38 }
 0x16f   : > { %680 = vmatpush1.bf16.msra.mxu0 %v2773_v28 }
 0x170   : > { %681 = vmatprep.subr.bf16.mxu0 %v2774_v29  ;;  %2595 = vmatpush3.bf16.msra.mxu1 %v2786_v42 }
 0x171   : > { %2596 = vmatprep.subr.bf16.mxu1 %v2961_v38 }
 0x173   : > { %682 = vmatpush1.bf16.msra.mxu0 %v2776_v30 }
 0x174   : > { %683 = vmatprep.subr.bf16.mxu0 %v2777_v31  ;;  %2597 = vmatpush3.bf16.msra.mxu1 %v2787_v44 }
 0x175   : > { %2598 = vmatprep.subr.bf16.mxu1 %v2961_v38 }
 0x177   : > { %684 = vmatpush1.bf16.msra.mxu0 %v2779_v32 }
 0x178   : > { %685 = vmatprep.subr.bf16.mxu0 %v2780_v33  ;;  %2599 = vmatpush3.bf16.msra.mxu1 %v2788_v48 }
 0x179   : > { %2600 = vmatprep.subr.bf16.mxu1 %v2961_v38 }
 0x17b   : > { %686 = vmatpush1.bf16.msra.mxu0 %v2782_v34 }
 0x17c   : > { %2632 = vmatprep.subr.bf16.mxu0 %v2961_v38  ;;  %2601 = vmatpush3.bf16.msra.mxu1 %v2789_v55 }
 0x17d   : > { %2602 = vmatprep.subr.bf16.mxu1 %v2961_v38 }
 0x17e   : > { %704 = vmatmul.mubr.bf16.vlgmr.msra.gmra.mrb[0].mxu0 %v498_v36 }
 0x17f   : > { %2634 = vmatprep.mubr.msk.bf16.mxu0 %vm2965_vm1, %v2961_v38 }
 0x180   : > { %2603 = vmatpush3.bf16.msra.mxu1 %v2790_v58 }
 0x181   : > { %2608 = vmatprep.subr.bf16.mxu1 %v2961_v38 }
 0x183   : > { %2605 = vmatmul.mubr.bf16.vlgmr.msra.gmra.mrb[0].mxu1 %v498_v36 }
 0x184   : > { %2610 = vmatprep.mubr.msk.bf16.mxu1 %vm2965_vm1, %v2961_v38 }
 0x251   : > { %v705_v50 = vpop.f32.mrb[0].mxu0 }
 0x252   : > { %v707_v51 = vpop.f32.mrb[1].mxu0  ;;  %v706_v57 = vadd.f32 %v705_v50, %v534_v52 }
 0x253   : > { %v708_v53 = vadd.f32 %v707_v51, %v538_v47  ;;  %v709_v54 = vpop.f32.mrb[2].mxu0 }
 0x254   : > { %v710_v56 = vpop.f32.mrb[3].mxu0 }
 0x255   : > { %905 = vrot.lane.b32.xlu1 %v708_v53, %s2962_s20  ;;  %899 = vrot.lane.b32.xlu0 %v708_v53, %s2963_s21 }
 0x259   : > { %902 = vrot.lane.b32.xlu0 %v708_v53, %s2964_s25  ;;  %753 = vrot.lane.b32.xlu1 %v706_v57, %s2963_s21 }
 0x25d   : > { %756 = vrot.lane.b32.xlu0 %v706_v57, %s2964_s25  ;;  %759 = vrot.lane.b32.xlu1 %v706_v57, %s2962_s20 }
 0x2c7   : > { %v906_v0 = vpop.permute.xlu1 %905  ;;  %v900_v1 = vpop.permute.xlu0 %899 }
 0x2c8   : > { %v924_v4 = vcombine.low %v900_v1, %v906_v0  ;;  %v925_v5 = vcombine.high %v900_v1, %v906_v0 }
 0x2ca   : > { %v932_v11 = vrot.slane %v924_v4, %v3202_v3  ;;  %v939_v12 = vrot.slane %v925_v5, %v3202_v3 }
 0x2cb   : > { %v903_v6 = vpop.permute.xlu0 %902  ;;  %v754_v7 = vpop.permute.xlu1 %753 }
 0x2cc   : > { %v908_v8 = vcombine.low %v708_v53, %v903_v6  ;;  %v909_v9 = vcombine.high %v708_v53, %v903_v6 }
 0x2ce   : > { %v916_v13 = vrot.slane %v908_v8, %v3202_v3  ;;  %v923_v14 = vrot.slane %v909_v9, %v3202_v3 }
 0x2cf   : > { %v757_v15 = vpop.permute.xlu0 %756  ;;  %v760_v16 = vpop.permute.xlu1 %759 }
 0x2d0   : > { %v940_v17 = vcombine.low %v916_v13, %v932_v11  ;;  %v941_v18 = vcombine.high %v916_v13, %v932_v11  ;;  %v956_v19 = vcombine.low %v923_v14, %v939_v12  ;;  %v957_v21 = vcombine.high %v923_v14, %v939_v12 }
 0x2d1   : > { %v762_v22 = vcombine.low %v706_v57, %v757_v15  ;;  %v763_v23 = vcombine.high %v706_v57, %v757_v15  ;;  %v778_v24 = vcombine.low %v754_v7, %v760_v16  ;;  %v779_v25 = vcombine.high %v754_v7, %v760_v16 }
 0x2d2   : > { %v948_v26 = vrot.slane %v940_v17, %v3205_v10  ;;  %v955_v27 = vrot.slane %v941_v18, %v3205_v10  ;;  %v964_v28 = vrot.slane %v956_v19, %v3205_v10  ;;  %v971_v29 = vrot.slane %v957_v21, %v3205_v10 }
 0x2d3   : > { %v770_v30 = vrot.slane %v762_v22, %v3202_v3  ;;  %v777_v31 = vrot.slane %v763_v23, %v3202_v3  ;;  %v786_v32 = vrot.slane %v778_v24, %v3202_v3  ;;  %v793_v33 = vrot.slane %v779_v25, %v3202_v3 }
 0x2d4   : > { %v976_v34 = vcombine.low %v948_v26, %v955_v27  ;;  %v2470_v36 = vcombine.high %v948_v26, %v955_v27  ;;  %v992_v37 = vcombine.low %v964_v28, %v971_v29  ;;  %v2471_v39 = vcombine.high %v964_v28, %v971_v29 }
 0x2d5   : > { %v794_v40 = vcombine.low %v770_v30, %v786_v32  ;;  %v795_v41 = vcombine.high %v770_v30, %v786_v32  ;;  %v810_v42 = vcombine.low %v777_v31, %v793_v33  ;;  %v811_v44 = vcombine.high %v777_v31, %v793_v33 }
 0x2d6   : > { %v983_v47 = vrot.slane %v976_v34, %v3202_v3  ;;  %v991_v48 = vrot.slane %v2470_v36, %v3202_v3  ;;  %v999_v50 = vrot.slane %v992_v37, %v3202_v3  ;;  %v1007_v51 = vrot.slane %v2471_v39, %v3202_v3 }
 0x2d7   : > { %v802_v52 = vrot.slane %v794_v40, %v3205_v10  ;;  %v809_v53 = vrot.slane %v795_v41, %v3205_v10  ;;  %v818_v54 = vrot.slane %v810_v42, %v3205_v10  ;;  %v825_v55 = vrot.slane %v811_v44, %v3205_v10  ;;  %v746_v41 = vpop.f32.mrb[0].mxu1 }
 0x2d8   : > { %v1008_v56 = vcombine.low %v983_v47, %v991_v48  ;;  %v1024_v57 = vcombine.low %v999_v50, %v1007_v51  ;;  %v1009_v14 = vcombine.high %v983_v47, %v991_v48  ;;  %v1025_v15 = vcombine.high %v999_v50, %v1007_v51  ;;  %v2606_v42 = vpop.f32.mrb[1].mxu1  ;;  %v2474_v48 = vld [vmem:[#allocation3] ss:$0 sm:$0xff] }
 0x2d9   : > { %v830_v58 = vcombine.low %v802_v52, %v809_v53  ;;  %v2468_v59 = vcombine.high %v802_v52, %v809_v53  ;;  %v846_v60 = vcombine.low %v818_v54, %v825_v55  ;;  %v2469_v61 = vcombine.high %v818_v54, %v825_v55  ;;  %v749_v44 = vpop.f32.mrb[2].mxu1 }
 0x2da   : > { %v1016_v62 = vrot.slane %v1008_v56, %v3205_v10  ;;  %v1032_v63 = vrot.slane %v1024_v57, %v3205_v10  ;;  %v1023_v18 = vrot.slane %v1009_v14, %v3205_v10  ;;  %v1039_v19 = vrot.slane %v1025_v15, %v3205_v10  ;;  %v2607_v47 = vpop.f32.mrb[3].mxu1 }
 0x2db   : > { %v837_v0 = vrot.slane %v830_v58, %v3202_v3  ;;  %v845_v1 = vrot.slane %v2468_v59, %v3202_v3  ;;  %v853_v2 = vrot.slane %v846_v60, %v3202_v3  ;;  %v861_v4 = vrot.slane %v2469_v61, %v3202_v3 }
 0x2dc   : > { %v1040_v5 = vcombine.low %v1016_v62, %v1032_v63  ;;  %v1041_v13 = vcombine.high %v1016_v62, %v1032_v63  ;;  %v1042_v23 = vcombine.low %v1023_v18, %v1039_v19  ;;  %v1043_v32 = vcombine.high %v1023_v18, %v1039_v19 }
 0x2dd   : > { %v862_v6 = vcombine.low %v837_v0, %v845_v1  ;;  %v878_v7 = vcombine.low %v853_v2, %v861_v4  ;;  %v863_v24 = vcombine.high %v837_v0, %v845_v1  ;;  %v879_v25 = vcombine.high %v853_v2, %v861_v4 }
 0x2de   : > { %v1194_v8 = vpack.c.bf16 %v1040_v5, %v1040_v5  ;;  %v1195_v17 = vpack.c.bf16 %v1041_v13, %v1041_v13  ;;  %v1196_v27 = vpack.c.bf16 %v1042_v23, %v1042_v23  ;;  %v1197_v34 = vpack.c.bf16 %v1043_v32, %v1043_v32  ;;  %v497_v5 = vld [vmem:[%s3122_s15 + $0x10] sm:$0xff] }
 0x2df   : > { %v870_v9 = vrot.slane %v862_v6, %v3205_v10  ;;  %v886_v11 = vrot.slane %v878_v7, %v3205_v10  ;;  %v877_v29 = vrot.slane %v863_v24, %v3205_v10  ;;  %v893_v30 = vrot.slane %v879_v25, %v3205_v10 }
 0x2e0   : > { %v1210_v12 = vsel %vm1205_vm2, %v1194_v8, 0  ;;  %v1256_v22 = vsel %vm1205_vm2, %v1195_v17, 0  ;;  %v1302_v31 = vsel %vm1205_vm2, %v1196_v27, 0  ;;  %v1348_v37 = vsel %vm1205_vm2, %v1197_v34, 0 }
 0x2e1   : > { %2609 = vmatpush3.bf16.xpose.msra.mxu1 %v1210_v12  ;;  %v894_v16 = vcombine.low %v870_v9, %v886_v11  ;;  %v895_v26 = vcombine.high %v870_v9, %v886_v11  ;;  %v896_v33 = vcombine.low %v877_v29, %v893_v30  ;;  %v897_v39 = vcombine.high %v877_v29, %v893_v30 }
 0x2e2   : > { %2614 = vmatprep.subr.bf16.mxu1 %v2961_v38  ;;  %v542_v6 = vrot.slane %v497_v5, %v3170_v45 }
 0x2e3   : > { %v1190_v21 = vpack.c.bf16 %v894_v16, %v894_v16  ;;  %v1191_v28 = vpack.c.bf16 %v895_v26, %v895_v26  ;;  %v1192_v36 = vpack.c.bf16 %v896_v33, %v896_v33  ;;  %v1193_v40 = vpack.c.bf16 %v897_v39, %v897_v39 }
 0x2e4   : > { %v747_v12 = vadd.f32 %v746_v41, %v542_v6 }
 0x2e8   : > { %2611 = vmatmul.mubr.msk.bf16.vlgmr.msra.gmra.mrb[4].mxu1 %vm1205_vm2, %v1190_v21 }
 0x2e9   : > { %2615 = vmatpush3.bf16.xpose.msra.mxu1 %v1256_v22  ;;  %2616 = vmatprep.mubr.msk.bf16.mxu1 %vm2965_vm1, %v2961_v38 }
 0x2ea   : > { %2620 = vmatprep.subr.bf16.mxu1 %v2961_v38 }
 0x2f0   : > { %2617 = vmatmul.mubr.msk.bf16.vlgmr.msra.gmra.mrb[8].mxu1 %vm1205_vm2, %v1191_v28 }
 0x2f1   : > { %2621 = vmatpush3.bf16.xpose.msra.mxu1 %v1302_v31  ;;  %2622 = vmatprep.mubr.msk.bf16.mxu1 %vm2965_vm1, %v2961_v38 }
 0x2f2   : > { %2626 = vmatprep.subr.bf16.mxu1 %v2961_v38 }
 0x2f8   : > { %2623 = vmatmul.mubr.msk.bf16.vlgmr.msra.gmra.mrb[12].mxu1 %vm1205_vm2, %v1192_v36 }
 0x2f9   : > { %2627 = vmatpush3.bf16.xpose.msra.mxu1 %v1348_v37  ;;  %2628 = vmatprep.mubr.msk.bf16.mxu1 %vm2965_vm1, %v2961_v38 }
 0x2fa   : > { %2638 = vmatprep.subr.bf16.mxu1 %v2961_v38 }
 0x300   : > { %2629 = vmatmul.mubr.msk.bf16.vlgmr.msra.gmra.mrb[16].mxu1 %vm1205_vm2, %v1193_v40 }
 0x301   : > { %2640 = vmatprep.mubr.msk.bf16.mxu1 %vm2965_vm1, %v2961_v38 }
 0x3bb   : > { %v1246_v50 = vpop.f32.mrb[4].mxu1 }
 0x3bc   : > { %v1247_v51 = vadd.f32 %v2474_v48, %v1246_v50  ;;  %v2612_v52 = vpop.f32.mrb[5].mxu1 }
 0x3bd   : > { %v1249_v53 = vpop.f32.mrb[6].mxu1 }
 0x3be   : > { %v2613_v54 = vpop.f32.mrb[7].mxu1  ;;  %v1391_v55 = vsel %vm1390_vm3, %v1247_v51, -inf }
 0x3bf   : > { %1392 = vmax.xlane.f32.xlu0 %v1391_v55 }
 0x3c3   : > { %v1292_v56 = vpop.f32.mrb[8].mxu1 }
 0x3c4   : > { %v1293_v57 = vadd.f32 %v2474_v48, %v1292_v56  ;;  %v2618_v58 = vpop.f32.mrb[9].mxu1 }
 0x3c5   : > { %v1295_v59 = vpop.f32.mrb[10].mxu1 }
 0x3c6   : > { %v2619_v60 = vpop.f32.mrb[11].mxu1  ;;  %v1394_v61 = vsel %vm1390_vm3, %v1293_v57, -inf }
 0x3c7   : > { %1395 = vmax.xlane.f32.xlu1 %v1394_v61 }
 0x3cb   : > { %v1338_v62 = vpop.f32.mrb[12].mxu1 }
 0x3cc   : > { %v1339_v63 = vadd.f32 %v2474_v48, %v1338_v62  ;;  %v2624_v0 = vpop.f32.mrb[13].mxu1 }
 0x3cd   : > { %v1341_v1 = vpop.f32.mrb[14].mxu1 }
 0x3ce   : > { %v2625_v2 = vpop.f32.mrb[15].mxu1  ;;  %v1397_v4 = vsel %vm1390_vm3, %v1339_v63, -inf }
 0x3cf   : > { %1398 = vmax.xlane.f32.xlu0 %v1397_v4 }
 0x3d3   : > { %v1384_v7 = vpop.f32.mrb[16].mxu1 }
 0x3d4   : > { %v1385_v8 = vadd.f32 %v2474_v48, %v1384_v7  ;;  %v2630_v9 = vpop.f32.mrb[17].mxu1 }
 0x3d5   : > { %v1387_v11 = vpop.f32.mrb[18].mxu1 }
 0x3d6   : > { %v2631_v13 = vpop.f32.mrb[19].mxu1  ;;  %v1400_v14 = vsel %vm1390_vm3, %v1385_v8, -inf }
 0x3d7   : > { %1401 = vmax.xlane.f32.xlu0 %v1400_v14 }
 0x3d8   : > { %1045 = vrot.lane.b32.xlu1 %v747_v12, %s2963_s21 }
 0x44c   : > { %v1393_v15 = vpop.xlane.xlu0 %1392 }
 0x44d   : > { %v1403_v16 = vsub.f32 %v1247_v51, %v1393_v15 }
 0x44f   : > { %v1407_v17 = vmul.f32 1.442695, %v1403_v16 }
 0x451   : > { %2839 = vpow2.f32 %v1407_v17 }
 0x454   : > { %v1396_v18 = vpop.xlane.xlu1 %1395 }
 0x455   : > { %v1404_v19 = vsub.f32 %v1293_v57, %v1396_v18 }
 0x457   : > { %v1409_v21 = vmul.f32 1.442695, %v1404_v19 }
 0x458   : > { %v1046_v36 = vpop.permute.xlu1 %1045 }
 0x459   : > { %2841 = vpow2.f32 %v1409_v21 }
 0x45b   : > { %v3266_v45 = vpop.eup %2839 }
 0x45c   : > { %v1415_v22 = vsel %vm1390_vm3, %v3266_v45, 0.0  ;;  %v1399_v25 = vpop.xlane.xlu0 %1398 }
 0x45d   : > { %1416 = vadd.xlane.f32.xlu1 %v1415_v22  ;;  %v1405_v26 = vsub.f32 %v1339_v63, %v1399_v25 }
 0x45f   : > { %v1411_v27 = vmul.f32 1.442695, %v1405_v26 }
 0x461   : > { %2843 = vpow2.f32 %v1411_v27 }
 0x463   : > { %v3270_v23 = vpop.eup %2841 }
 0x464   : > { %v1418_v24 = vsel %vm1390_vm3, %v3270_v23, 0.0  ;;  %v1402_v28 = vpop.xlane.xlu0 %1401 }
 0x465   : > { %1419 = vadd.xlane.f32.xlu0 %v1418_v24  ;;  %v1406_v29 = vsub.f32 %v1385_v8, %v1402_v28 }
 0x467   : > { %v1413_v30 = vmul.f32 1.442695, %v1406_v29 }
 0x469   : > { %2845 = vpow2.f32 %v1413_v30 }
 0x46b   : > { %v3276_v31 = vpop.eup %2843 }
 0x46c   : > { %v1421_v32 = vsel %vm1390_vm3, %v3276_v31, 0.0 }
 0x46e   : > { %1051 = vrot.lane.b32.xlu1 %v747_v12, %s2962_s20 }
 0x473   : > { %v3280_v33 = vpop.eup %2845 }
 0x474   : > { %v1424_v34 = vsel %vm1390_vm3, %v3280_v33, 0.0 }
 0x47b   : > { %1048 = vrot.lane.b32.xlu0 %v747_v12, %s2964_s25 }
 0x492   : > { %1422 = vadd.xlane.f32.xlu1 %v1421_v32 }
 0x49a   : > { %1425 = vadd.xlane.f32.xlu0 %v1424_v34 }
 0x4ea   : > { %v1417_v37 = vpop.xlane.xlu1 %1416 }
 0x4eb   : > { %2847 = vrcp.f32 %v1417_v37 }
 0x4ee   : > { %v1052_v39 = vpop.permute.xlu1 %1051 }
 0x4ef   : > { %v1070_v41 = vcombine.low %v1046_v36, %v1052_v39  ;;  %v1071_v42 = vcombine.high %v1046_v36, %v1052_v39 }
 0x4f1   : > { %v1078_v50 = vrot.slane %v1070_v41, %v3202_v3  ;;  %v1085_v51 = vrot.slane %v1071_v42, %v3202_v3 }
 0x4f2   : > { %v1420_v40 = vpop.xlane.xlu0 %1419 }
 0x4f3   : > { %2849 = vrcp.f32 %v1420_v40 }
 0x4f6   : > { %v1049_v44 = vpop.permute.xlu0 %1048 }
 0x4f7   : > { %v1054_v47 = vcombine.low %v747_v12, %v1049_v44  ;;  %v1055_v48 = vcombine.high %v747_v12, %v1049_v44  ;;  %v2848_v12 = vpop.eup %2847 }
 0x4f8   : > { %v1431_v24 = vmul.f32 %v2848_v12, %v3266_v45 }
 0x4f9   : > { %v1062_v52 = vrot.slane %v1054_v47, %v3202_v3  ;;  %v1069_v53 = vrot.slane %v1055_v48, %v3202_v3 }
 0x4fa   : > { %v1435_v34 = vpack.c.bf16 %v1431_v24, %v1431_v24 }
 0x4fb   : > { %v1086_v54 = vcombine.low %v1062_v52, %v1078_v50  ;;  %v1087_v55 = vcombine.high %v1062_v52, %v1078_v50  ;;  %v1102_v56 = vcombine.low %v1069_v53, %v1085_v51  ;;  %v1103_v57 = vcombine.high %v1069_v53, %v1085_v51  ;;  %v2791_v50 = vld [vmem:[%s3107_s9] sm:$0xff]   ;;  %v2793_v51 = vld [vmem:[%s3107_s9 + $0x10] sm:$0xff]   ;;  %v2794_v52 = vld [vmem:[%s3107_s9 + $0x18] sm:$0xff]  }
 0x4fc   : > { %v2796_v53 = vld [vmem:[%s3107_s9 + $0x28] sm:$0xff]  }
 0x4fd   : > { %v1094_v58 = vrot.slane %v1086_v54, %v3205_v10  ;;  %v1101_v59 = vrot.slane %v1087_v55, %v3205_v10  ;;  %v1110_v60 = vrot.slane %v1102_v56, %v3205_v10  ;;  %v1117_v61 = vrot.slane %v1103_v57, %v3205_v10  ;;  %v2850_v17 = vpop.eup %2849 }
 0x4fe   : > { %v1432_v25 = vmul.f32 %v2850_v17, %v3270_v23 }
 0x4ff   : > { %v1122_v62 = vcombine.low %v1094_v58, %v1101_v59  ;;  %v2472_v63 = vcombine.high %v1094_v58, %v1101_v59  ;;  %v1138_v0 = vcombine.low %v1110_v60, %v1117_v61  ;;  %v2473_v1 = vcombine.high %v1110_v60, %v1117_v61 }
 0x500   : > { %v1436_v36 = vpack.c.bf16 %v1432_v25, %v1432_v25 }
 0x501   : > { %v1129_v2 = vrot.slane %v1122_v62, %v3202_v3  ;;  %v1137_v4 = vrot.slane %v2472_v63, %v3202_v3  ;;  %v1145_v5 = vrot.slane %v1138_v0, %v3202_v3  ;;  %v1153_v6 = vrot.slane %v2473_v1, %v3202_v3 }
 0x503   : > { %v1154_v7 = vcombine.low %v1129_v2, %v1137_v4  ;;  %v1170_v8 = vcombine.low %v1145_v5, %v1153_v6  ;;  %v1155_v9 = vcombine.high %v1129_v2, %v1137_v4  ;;  %v1171_v11 = vcombine.high %v1145_v5, %v1153_v6 }
 0x505   : > { %v1162_v13 = vrot.slane %v1154_v7, %v3205_v10  ;;  %v1178_v14 = vrot.slane %v1170_v8, %v3205_v10  ;;  %v1169_v15 = vrot.slane %v1155_v9, %v3205_v10  ;;  %v1185_v16 = vrot.slane %v1171_v11, %v3205_v10 }
 0x507   : > { %v1186_v18 = vcombine.low %v1162_v13, %v1178_v14  ;;  %v1187_v19 = vcombine.high %v1162_v13, %v1178_v14  ;;  %v1188_v21 = vcombine.low %v1169_v15, %v1185_v16  ;;  %v1189_v22 = vcombine.high %v1169_v15, %v1185_v16 }
 0x509   : > { %v1439_v26 = vpack.c.bf16 %v1186_v18, %v1186_v18  ;;  %v1440_v27 = vpack.c.bf16 %v1187_v19, %v1187_v19  ;;  %v1441_v30 = vpack.c.bf16 %v1188_v21, %v1188_v21  ;;  %v1442_v32 = vpack.c.bf16 %v1189_v22, %v1189_v22  ;;  %v2797_v19 = vld [vmem:[%s3107_s9 + $0x30] sm:$0xff]  }
 0x50b   : > { %v1448_v28 = vsel %vm1446_vm4, %v1439_v26, 0  ;;  %v1494_v29 = vsel %vm1446_vm4, %v1440_v27, 0  ;;  %v1540_v45 = vsel %vm1446_vm4, %v1441_v30, 0  ;;  %v1586_v23 = vsel %vm1446_vm4, %v1442_v32, 0  ;;  %v2798_v30 = vld [vmem:[%s3107_s9 + $0x38] sm:$0xff]  }
 0x50c   : > { %2633 = vmatpush3.bf16.msra.mxu0 %v1448_v28  ;;  %2639 = vmatpush3.bf16.msra.mxu1 %v1494_v29 }
 0x50d   : > { %2644 = vmatprep.subr.bf16.mxu0 %v2961_v38  ;;  %2650 = vmatprep.subr.bf16.mxu1 %v2961_v38 }
 0x50f   : > { %2635 = vmatmul.mubr.msk.bf16.vlgmr.msra.gmra.mrb[4].mxu0 %vm1390_vm3, %v1435_v34  ;;  %2641 = vmatmul.mubr.msk.bf16.vlgmr.msra.gmra.mrb[20].mxu1 %vm1390_vm3, %v1436_v36 }
 0x510   : > { %2645 = vmatpush3.bf16.msra.mxu0 %v1540_v45  ;;  %2651 = vmatpush3.bf16.msra.mxu1 %v1586_v23 }
 0x511   : > { %2646 = vmatprep.mubr.msk.bf16.mxu0 %vm2965_vm1, %v2961_v38  ;;  %2652 = vmatprep.mubr.msk.bf16.mxu1 %vm2965_vm1, %v2961_v38 }
 0x512   : > { %2656 = vmatprep.subr.bf16.mxu0 %v2961_v38 }
 0x51f   : > { %v1423_v37 = vpop.xlane.xlu1 %1422 }
 0x520   : > { %2851 = vrcp.f32 %v1423_v37 }
 0x527   : > { %v1426_v39 = vpop.xlane.xlu0 %1425 }
 0x528   : > { %2853 = vrcp.f32 %v1426_v39 }
 0x52a   : > { %v2852_v40 = vpop.eup %2851 }
 0x52b   : > { %v1433_v41 = vmul.f32 %v2852_v40, %v3276_v31  ;;  %v2792_v31 = vld [vmem:[%s3107_s9 + $0x8] sm:$0xff]  }
 0x52d   : > { %v1437_v42 = vpack.c.bf16 %v1433_v41, %v1433_v41 }
 0x52f   : > { %2647 = vmatmul.mubr.msk.bf16.vlgmr.msra.gmra.mrb[8].mxu0 %vm1390_vm3, %v1437_v42 }
 0x530   : > { %2672 = vmatprep.mubr.msk.bf16.mxu0 %vm2965_vm1, %v2961_v38  ;;  %2657 = vmatpush3.bf16.msra.mxu0 %v2791_v50 }
 0x531   : > { %2658 = vmatprep.subr.bf16.mxu0 %v2961_v38 }
 0x532   : > { %v2854_v44 = vpop.eup %2853 }
 0x533   : > { %v1434_v47 = vmul.f32 %v2854_v44, %v3280_v33  ;;  %v2795_v33 = vld [vmem:[%s3107_s9 + $0x20] sm:$0xff]  }
 0x534   : > { %2659 = vmatpush3.bf16.msra.mxu0 %v2792_v31 }
 0x535   : > { %v1438_v48 = vpack.c.bf16 %v1434_v47, %v1434_v47  ;;  %2660 = vmatprep.subr.bf16.mxu0 %v2961_v38 }
 0x537   : > { %2653 = vmatmul.mubr.msk.bf16.vlgmr.msra.gmra.mrb[24].mxu1 %vm1390_vm3, %v1438_v48 }
 0x538   : > { %2050 = vmatprep.mubr.bf16.mxu1 %v2960_v20  ;;  %2661 = vmatpush3.bf16.msra.mxu0 %v2793_v51 }
 0x539   : > { %2662 = vmatprep.subr.bf16.mxu0 %v2961_v38 }
 0x53c   : > { %2663 = vmatpush3.bf16.msra.mxu0 %v2794_v52 }
 0x53d   : > { %2664 = vmatprep.subr.bf16.mxu0 %v2961_v38 }
 0x540   : > { %2665 = vmatpush3.bf16.msra.mxu0 %v2795_v33 }
 0x541   : > { %2666 = vmatprep.subr.bf16.mxu0 %v2961_v38 }
 0x544   : > { %2667 = vmatpush3.bf16.msra.mxu0 %v2796_v53 }
 0x545   : > { %2668 = vmatprep.subr.bf16.mxu0 %v2961_v38 }
 0x548   : > { %2669 = vmatpush3.bf16.msra.mxu0 %v2797_v19 }
 0x549   : > { %2670 = vmatprep.subr.bf16.mxu0 %v2961_v38 }
 0x54c   : > { %2671 = vmatpush3.bf16.msra.mxu0 %v2798_v30 }
 0x5e2   : > { %v1484_v20 = vpop.f32.mrb[4].mxu0  ;;  %v1530_v54 = vpop.f32.mrb[20].mxu1 }
 0x5e3   : > { %v2636_v55 = vpop.f32.mrb[5].mxu0  ;;  %v2642_v56 = vpop.f32.mrb[21].mxu1 }
 0x5e4   : > { %v1487_v57 = vpop.f32.mrb[6].mxu0  ;;  %v1533_v58 = vpop.f32.mrb[22].mxu1 }
 0x5e5   : > { %v2637_v59 = vpop.f32.mrb[7].mxu0  ;;  %v2643_v60 = vpop.f32.mrb[23].mxu1 }
 0x602   : > { %v1576_v61 = vpop.f32.mrb[8].mxu0 }
 0x603   : > { %v1628_v62 = vcombine.low %v1484_v20, %v1576_v61  ;;  %v1629_v63 = vcombine.high %v1484_v20, %v1576_v61  ;;  %v2648_v0 = vpop.f32.mrb[9].mxu0 }
 0x604   : > { %v1579_v1 = vpop.f32.mrb[10].mxu0  ;;  %v2804_v0 = vld [vmem:[%s3112_s27 + $0x14] ss:$8 sps:$4 sm:$0xff]  }
 0x605   : > { %v2649_v2 = vpop.f32.mrb[11].mxu0  ;;  %v1636_v9 = vrot.slane %v1628_v62, %v3202_v3  ;;  %v1643_v11 = vrot.slane %v1629_v63, %v3202_v3  ;;  %v2799_v62 = vld [vmem:[%s3112_s27] ss:$8 sps:$4 sm:$0xff]   ;;  %v2801_v63 = vld [vmem:[%s3112_s27 + $0x4] ss:$8 sps:$4 sm:$0xff]  }
 0x606   : > { %2018 = vmatprep.subr.bf16.mxu1 %v2801_v63  ;;  %v2802_v1 = vld [vmem:[%s3112_s27 + $0x10] ss:$8 sps:$4 sm:$0xff]   ;;  %v2807_v2 = vld [vmem:[%s3112_s27 + $0x24] ss:$8 sps:$4 sm:$0xff]  }
 0x607   : > { %2019 = vmatpush1.bf16.msra.mxu1 %v2799_v62 }
 0x608   : > { %2020 = vmatprep.subr.bf16.mxu1 %v2804_v0 }
 0x60a   : > { %v1622_v4 = vpop.f32.mrb[24].mxu1 }
 0x60b   : > { %v1644_v5 = vcombine.low %v1530_v54, %v1622_v4  ;;  %v1645_v6 = vcombine.high %v1530_v54, %v1622_v4  ;;  %v2654_v7 = vpop.f32.mrb[25].mxu1  ;;  %v1800_v54 = vsub.s32 1, %v3165_v43  ;;  %2021 = vmatpush1.bf16.msra.mxu1 %v2802_v1  ;;  %v2805_v4 = vld [vmem:[%s3112_s27 + $0x20] ss:$8 sps:$4 sm:$0xff]  }
 0x60c   : > { %v1625_v8 = vpop.f32.mrb[26].mxu1  ;;  %2022 = vmatprep.subr.bf16.mxu1 %v2807_v2 }
 0x60d   : > { %v1652_v12 = vrot.slane %v1644_v5, %v3202_v3  ;;  %v1659_v13 = vrot.slane %v1645_v6, %v3202_v3  ;;  %v2655_v14 = vpop.f32.mrb[27].mxu1  ;;  %v1801_v55 = vrot.slane %v3180_v49, %v1800_v54  ;;  %v2810_v8 = vld [vmem:[%s3112_s27 + $0x34] ss:$8 sps:$4 sm:$0xff]  }
 0x60e   : > { %v2814_v14 = vld [vmem:[%s3112_s27 + $0x50] ss:$8 sps:$4 sm:$0xff]  }
 0x60f   : > { %v1660_v15 = vcombine.low %v1636_v9, %v1652_v12  ;;  %v1661_v16 = vcombine.high %v1636_v9, %v1652_v12  ;;  %v1676_v17 = vcombine.low %v1643_v11, %v1659_v13  ;;  %v1677_v18 = vcombine.high %v1643_v11, %v1659_v13  ;;  %2023 = vmatpush1.bf16.msra.mxu1 %v2805_v4  ;;  %v2808_v9 = vld [vmem:[%s3112_s27 + $0x30] ss:$8 sps:$4 sm:$0xff]   ;;  %v2813_v11 = vld [vmem:[%s3112_s27 + $0x44] ss:$8 sps:$4 sm:$0xff]   ;;  %v2811_v12 = vld [vmem:[%s3112_s27 + $0x40] ss:$8 sps:$4 sm:$0xff]  }
 0x610   : > { %2024 = vmatprep.subr.bf16.mxu1 %v2810_v8  ;;  %v2816_v13 = vld [vmem:[%s3112_s27 + $0x54] ss:$8 sps:$4 sm:$0xff]  }
 0x611   : > { %v1668_v21 = vrot.slane %v1660_v15, %v3205_v10  ;;  %v1675_v22 = vrot.slane %v1661_v16, %v3205_v10  ;;  %v1684_v24 = vrot.slane %v1676_v17, %v3205_v10  ;;  %v1691_v25 = vrot.slane %v1677_v18, %v3205_v10  ;;  %v2819_v15 = vld [vmem:[%s3112_s27 + $0x64] ss:$8 sps:$4 sm:$0xff]   ;;  %v2817_v16 = vld [vmem:[%s3112_s27 + $0x60] ss:$8 sps:$4 sm:$0xff]   ;;  %v2822_v17 = vld [vmem:[%s3112_s27 + $0x74] ss:$8 sps:$4 sm:$0xff]  }
 0x612   : > { %v2820_v18 = vld [vmem:[%s3112_s27 + $0x70] ss:$8 sps:$4 sm:$0xff]  }
 0x613   : > { %v1696_v26 = vcombine.low %v1668_v21, %v1675_v22  ;;  %v2483_v27 = vcombine.high %v1668_v21, %v1675_v22  ;;  %v1712_v28 = vcombine.low %v1684_v24, %v1691_v25  ;;  %v2484_v29 = vcombine.high %v1684_v24, %v1691_v25  ;;  %2025 = vmatpush1.bf16.msra.mxu1 %v2808_v9 }
 0x614   : > { %2026 = vmatprep.subr.bf16.mxu1 %v2813_v11  ;;  %v1905_v24 = vsub.s32 2, %v3165_v43  ;;  %v1910_v25 = vsub.s32 3, %v3165_v43 }
 0x615   : > { %v1703_v32 = vrot.slane %v1696_v26, %v3202_v3  ;;  %v1711_v34 = vrot.slane %v2483_v27, %v3202_v3  ;;  %v1719_v36 = vrot.slane %v1712_v28, %v3202_v3  ;;  %v1727_v45 = vrot.slane %v2484_v29, %v3202_v3 }
 0x616   : > { %v1906_v26 = vrot.slane %v3180_v49, %v1905_v24  ;;  %v1911_v29 = vrot.slane %v3180_v49, %v1910_v25 }
 0x617   : > { %v1729_v23 = vcombine.high %v1703_v32, %v1711_v34  ;;  %v1745_v37 = vcombine.high %v1719_v36, %v1727_v45  ;;  %v1728_v39 = vcombine.low %v1703_v32, %v1711_v34  ;;  %v1744_v40 = vcombine.low %v1719_v36, %v1727_v45  ;;  %2027 = vmatpush1.bf16.msra.mxu1 %v2811_v12  ;;  %v2823_v36 = vld [vmem:[%s3117_s23 + $0x40] sm:$0xff]  }
 0x618   : > { %2028 = vmatprep.subr.bf16.mxu1 %v2816_v13  ;;  %v2824_v45 = vld [vmem:[%s3117_s23] sm:$0xff]   ;;  %2566 = vmatprep.subr.bf16.mxu0 %v2823_v36  ;;  %v2270_v36 = vsub.s32 7, %v3165_v43 }
 0x619   : > { %v1743_v38 = vrot.slane %v1729_v23, %v3205_v10  ;;  %v1759_v41 = vrot.slane %v1745_v37, %v3205_v10  ;;  %v1736_v42 = vrot.slane %v1728_v39, %v3205_v10  ;;  %v1752_v44 = vrot.slane %v1744_v40, %v3205_v10  ;;  %v2825_v23 = vld [vmem:[%s3117_s23 + $0x48] sm:$0xff]   ;;  %v2827_v39 = vld [vmem:[%s3117_s23 + $0x50] sm:$0xff]  }
 0x61a   : > { %v2826_v37 = vld [vmem:[%s3117_s23 + $0x8] sm:$0xff]   ;;  %v2828_v40 = vld [vmem:[%s3117_s23 + $0x10] sm:$0xff]  }
 0x61b   : > { %v1762_v47 = vcombine.low %v1743_v38, %v1759_v41  ;;  %v1761_v48 = vcombine.high %v1736_v42, %v1752_v44  ;;  %v1763_v50 = vcombine.high %v1743_v38, %v1759_v41  ;;  %v1760_v31 = vcombine.low %v1736_v42, %v1752_v44  ;;  %2029 = vmatpush1.bf16.msra.mxu1 %v2814_v14  ;;  %v2829_v38 = vld [vmem:[%s3117_s23 + $0x58] sm:$0xff]   ;;  %v2831_v42 = vld [vmem:[%s3117_s23 + $0x60] sm:$0xff]  }
 0x61c   : > { %2030 = vmatprep.subr.bf16.mxu1 %v2819_v15  ;;  %v2830_v41 = vld [vmem:[%s3117_s23 + $0x18] sm:$0xff]   ;;  %v2832_v44 = vld [vmem:[%s3117_s23 + $0x20] sm:$0xff]   ;;  %v2113_v14 = vsub.s32 5, %v3165_v43 }
 0x61d   : > { %1769 = vrot.lane.b32.xlu1 %v1762_v47, %s2964_s25  ;;  %1765 = vrot.lane.b32.xlu0 %v1761_v48, %s2962_s20  ;;  %v2833_v47 = vld [vmem:[%s3117_s23 + $0x68] sm:$0xff]  }
 0x61e   : > { %v2834_v48 = vld [vmem:[%s3117_s23 + $0x28] sm:$0xff]  }
 0x61f   : > { %2031 = vmatpush1.bf16.msra.mxu1 %v2817_v16  ;;  %v2114_v16 = vrot.slane %v3180_v49, %v2113_v14 }
 0x620   : > { %2032 = vmatprep.subr.bf16.mxu1 %v2822_v17 }
 0x621   : > { %1773 = vrot.lane.b32.xlu1 %v1763_v50, %s2963_s21  ;;  %v2835_v50 = vld [vmem:[%s3117_s23 + $0x70] sm:$0xff]  }
 0x623   : > { %2033 = vmatpush1.bf16.msra.mxu1 %v2820_v18 }
 0x68f   : > { %v1770_v3 = vpop.permute.xlu1 %1769  ;;  %v1766_v51 = vpop.permute.xlu0 %1765 }
 0x690   : > { %v1776_v52 = vsel %vm1205_vm2, %v1760_v31, %v1766_v51  ;;  %v2836_v31 = vld [vmem:[%s3117_s23 + $0x30] sm:$0xff]   ;;  %v2838_v51 = vld [vmem:[%s3117_s23 + $0x38] sm:$0xff]  }
 0x691   : > { %v1778_v10 = vsel %vm1777_vm5, %v1776_v52, %v1770_v3  ;;  %v2837_v3 = vld [vmem:[%s3117_s23 + $0x78] sm:$0xff]   ;;  %v1932_v52 = vsub.s32 4, %v3165_v43 }
 0x693   : > { %v1774_v33 = vpop.permute.xlu1 %1773 }
 0x694   : > { %v1780_v53 = vsel %vm1779_vm6, %v1778_v10, %v1774_v33  ;;  %v1933_v33 = vrot.slane %v3180_v49, %v1932_v52  ;;  %v1937_v10 = vrot.slane %v3173_v46, %v1932_v52  ;;  %v2265_v49 = vsub.s32 6, %v3165_v43 }
 0x695   : > { %v1781_v20 = vpack.c.bf16 %v1780_v53, %v1780_v53 }
 0x697   : > { %2673 = vmatmul.mubr.bf16.vlgmr.msra.gmra.mrb[12].mxu0 %v1781_v20 }
 0x698   : > { %2567 = vmatpush3.bf16.msra.mxu0 %v2824_v45  ;;  %v2863_v45 = vld [vmem:[%s3122_s15] sm:$0xff] }
 0x699   : > { %2568 = vmatprep.subr.bf16.mxu0 %v2825_v23  ;;  %v2266_v23 = vrot.slane %v2863_v45, %v2265_v49 }
 0x69c   : > { %2569 = vmatpush3.bf16.msra.mxu0 %v2826_v37 }
 0x69d   : > { %2570 = vmatprep.subr.bf16.mxu0 %v2827_v39  ;;  %v2271_v39 = vrot.slane %v2863_v45, %v2270_v36 }
 0x6a0   : > { %2571 = vmatpush3.bf16.msra.mxu0 %v2828_v40 }
 0x6a1   : > { %2572 = vmatprep.subr.bf16.mxu0 %v2829_v38 }
 0x6a4   : > { %2573 = vmatpush3.bf16.msra.mxu0 %v2830_v41 }
 0x6a5   : > { %2574 = vmatprep.subr.bf16.mxu0 %v2831_v42 }
 0x6a8   : > { %2575 = vmatpush3.bf16.msra.mxu0 %v2832_v44 }
 0x6a9   : > { %2576 = vmatprep.subr.bf16.mxu0 %v2833_v47 }
 0x6ac   : > { %2577 = vmatpush3.bf16.msra.mxu0 %v2834_v48 }
 0x6ad   : > { %2578 = vmatprep.subr.bf16.mxu0 %v2835_v50 }
 0x6b0   : > { %2579 = vmatpush3.bf16.msra.mxu0 %v2836_v31 }
 0x6b1   : > { %2580 = vmatprep.subr.bf16.mxu0 %v2837_v3 }
 0x6b4   : > { %2581 = vmatpush3.bf16.msra.mxu0 %v2838_v51 }
 0x76a   : > { %v1884_v56 = vpop.f32.mrb[12].mxu0 }
 0x76b   : > { %v1885_v57 = vadd.f32 %v1884_v56, %v1801_v55  ;;  %v2674_v58 = vpop.f32.mrb[13].mxu0 }
 0x76c   : > { %v1887_v59 = vpop.f32.mrb[14].mxu0 }
 0x76d   : > { %v2675_v60 = vpop.f32.mrb[15].mxu0  ;;  %v1890_v61 = vadd.f32 %v1885_v57, %v3152_v35 }
 0x76f   : > { %1891 = vadd.xlane.f32.xlu0 %v1890_v61 }
 0x7fc   : > { %v1892_v35 = vpop.xlane.xlu0 %1891 }
 0x7fd   : > { %v1894_v5 = vmul.f32 0.0078125, %v1892_v35 }
 0x7ff   : > { %v1895_v6 = vsub.f32 %v1890_v61, %v1894_v5 }
 0x801   : > { %v1896_v7 = vmul.f32 %v1895_v6, %v1895_v6 }
 0x803   : > { %1897 = vadd.xlane.f32.xlu1 %v1896_v7 }
 0x890   : > { %v1898_v19 = vpop.xlane.xlu1 %1897 }
 0x891   : > { %v1899_v21 = vmul.f32 0.0078125, %v1898_v19 }
 0x893   : > { %v1900_v22 = vadd.f32 1e-12, %v1899_v21 }
 0x895   : > { %2855 = vrsqrt.f32 %v1900_v22 }
 0x89f   : > { %v2856_v27 = vpop.eup %2855 }
 0x8a0   : > { %v1902_v28 = vmul.f32 %v2856_v27, %v1895_v6 }
 0x8a2   : > { %v1907_v30 = vmul.f32 %v1906_v26, %v1902_v28 }
 0x8a4   : > { %v3380_v32 = vadd.f32 %v1911_v29, %v1907_v30 }
 0x8a6   : > { %v1913_v34 = vpack.c.bf16 %v3380_v32, %v3380_v32 }
 0x8a8   : > { %2051 = vmatmul.mubr.bf16.vlgmr.msra.gmra.mrb[28].mxu1 %v1913_v34 }
 0x97b   : > { %v2052_v53 = vpop.f32.mrb[28].mxu1 }
 0x97c   : > { %v2053_v20 = vadd.f32 %v2052_v53, %v1933_v33  ;;  %v2054_v54 = vpop.f32.mrb[29].mxu1 }
 0x97d   : > { %v2055_v55 = vadd.f32 %v2054_v54, %v1937_v10  ;;  %v2056_v56 = vpop.f32.mrb[30].mxu1 }
 0x97e   : > { %v2061_v57 = vmul.f32 0.044715, %v2053_v20  ;;  %v2057_v58 = vpop.f32.mrb[31].mxu1  ;;  %v2059_v5 = vmul.f32 0.5, %v2053_v20 }
 0x97f   : > { %v2062_v59 = vmul.f32 0.044715, %v2055_v55  ;;  %v2060_v7 = vmul.f32 0.5, %v2055_v55 }
 0x980   : > { %v2063_v60 = vmul.f32 %v2061_v57, %v2053_v20 }
 0x981   : > { %v2064_v61 = vmul.f32 %v2062_v59, %v2055_v55 }
 0x982   : > { %v2065_v62 = vmul.f32 %v2063_v60, %v2053_v20 }
 0x983   : > { %v2066_v63 = vmul.f32 %v2064_v61, %v2055_v55 }
 0x984   : > { %v2067_v0 = vadd.f32 %v2065_v62, %v2053_v20 }
 0x985   : > { %v2068_v1 = vadd.f32 %v2066_v63, %v2055_v55 }
 0x986   : > { %v2069_v2 = vmul.f32 0.7978846, %v2067_v0 }
 0x987   : > { %v2070_v4 = vmul.f32 0.7978846, %v2068_v1 }
 0x988   : > { %2857 = vtanh.f32 %v2069_v2 }
 0x989   : > { %2859 = vtanh.f32 %v2070_v4 }
 0x992   : > { %v2858_v35 = vpop.eup %2857 }
 0x993   : > { %v2860_v46 = vpop.eup %2859  ;;  %v2073_v6 = vadd.f32 1.0, %v2858_v35 }
 0x994   : > { %v2074_v8 = vadd.f32 1.0, %v2860_v46 }
 0x995   : > { %v2075_v9 = vmul.f32 %v2073_v6, %v2059_v5 }
 0x996   : > { %v2076_v11 = vmul.f32 %v2074_v8, %v2060_v7 }
 0x997   : > { %v2077_v13 = vpack.c.bf16 %v2075_v9, %v2075_v9 }
 0x998   : > { %v2078_v12 = vpack.c.bf16 %v2076_v11, %v2076_v11 }
 0x99a   : > { %2243 = vmatprep.mubr.bf16.mxu0 %v2078_v12 }
 0x99b   : > { %2244 = vmatmul.mubr.bf16.vlgmr.msra.gmra.mrb[16].mxu0 %v2077_v13 }
 0xa6e   : > { %v2582_v15 = vpop.f32.mrb[16].mxu0 }
 0xa6f   : > { %v2583_v17 = vpop.f32.mrb[17].mxu0 }
 0xa70   : > { %v2584_v18 = vadd.f32 %v2583_v17, %v2582_v15  ;;  %v2585_v19 = vpop.f32.mrb[18].mxu0 }
 0xa71   : > { %v2586_v21 = vpop.f32.mrb[19].mxu0 }
 0xa72   : > { %v2246_v22 = vadd.f32 %v2584_v18, %v2114_v16 }
 0xa74   : > { %v2251_v24 = vadd.f32 %v2246_v22, %v3380_v32 }
 0xa76   : > { %2252 = vadd.xlane.f32.xlu0 %v2251_v24 }
 0xb03   : > { %v2253_v25 = vpop.xlane.xlu0 %2252 }
 0xb04   : > { %v2254_v26 = vmul.f32 0.0078125, %v2253_v25 }
 0xb06   : > { %v2255_v27 = vsub.f32 %v2251_v24, %v2254_v26 }
 0xb08   : > { %v2256_v28 = vmul.f32 %v2255_v27, %v2255_v27 }
 0xb0a   : > { %2257 = vadd.xlane.f32.xlu0 %v2256_v28 }
 0xb97   : > { %v2258_v29 = vpop.xlane.xlu0 %2257 }
 0xb98   : > { %v2259_v30 = vmul.f32 0.0078125, %v2258_v29 }
 0xb9a   : > { %v2260_v34 = vadd.f32 1e-12, %v2259_v30 }
 0xb9c   : > { %2861 = vrsqrt.f32 %v2260_v34 }
 0xba6   : > { %v2862_v37 = vpop.eup %2861 }
 0xba7   : > { %v2262_v40 = vmul.f32 %v2862_v37, %v2255_v27  ;;  %2277 = sbr.rel (%p2525_p1) target bundleno = 2990 (0xbae), region = 64 }
 0xba9   : > { %v2267_v32 = vmul.f32 %v2266_v23, %v2262_v40 }
 0xbab   : > { %v2272_v38 = vadd.f32 %v2271_v39, %v2267_v32 }
 0xbad   : > { %2273 = vst [vmem:[#allocation2] sm:$0xff] %v2272_v38  ;;  %2278 = vst [vmem:[%s3126_s30] sm:$0x1] (!%p2525_p1), %v2272_v38 }
 0xbae PF: > { %s2526_s26 = sshll.u32 %s2946_s13, 4  ;;  %s3503_s27 = sld [smem:[#allocation18_spill]] }
 0xbaf   : > { %s2292_s29 = sshll.u32 %s3126_s30, 4  ;;  %s3504_s23 = sand.u32 1, %s2934_s10   ;;  %s2293_s29 = int_to_ptr.vmem [resolvable:$true] %s2292_s29 }
 0xbb0   : > { %s2280_s24 = scalar_lea.sflag [#allocation5], %s3504_s23  ;;  %s2864_s11 = scalar_lea.vmem %s2293_s29, 16 }
 0xbb1   : > { %p2865_p2 = scmp.ne.s32.totalorder %s2293_s29, %s2864_s11  ;;  %s2968_s12 = smov [#allocation4]  }
 0xbb2   : > { %s2868_s15 = sshll.u32 %s2968_s12, 4  ;;  %s2869_s15 = int_to_ptr.vmem [resolvable:$false] %s2868_s15 }
 0xbb3   : > { %p2866_p4 = pnand %p2865_p2, %p3068_p3  ;;  %s2870_s22 = scalar_lea.vmem %s2869_s15, 32 }
 0xbb4   : > { %s3415_s18 = scalar_lea.hbm %s3503_s27, %s2526_s26  ;;  %p2871_p6 = scmp.lt.s32.totalorder %s2293_s29, %s2869_s15 }
 0xbb5   : > { %p2867_p5 = pneg %p2866_p4  ;;  %p2872_p7 = scmp.lt.s32.totalorder %s2870_s22, %s2864_s11 }
 0xbb7   : > { %p2873_p8 = por %p2872_p7, %p2871_p6 }
 0xbb9   : > { %p2874_p10 = pnand %p2873_p8, %p2867_p5 }
 0xbbb   : > { %2877 = shalt.err (!%p2874_p10)
}
 0xbbc   : > { %s2878_s13 = scalar_lea.hbm %s3415_s18, 16  ;;  %s2882_s14 = scalar_lea.hbm %s3503_s27, 32 }
 0xbbd   : > { %p2879_p11 = scmp.ne.s32.totalorder %s3415_s18, %s2878_s13  ;;  %p2883_p0 = scmp.lt.u32.totalorder %s3415_s18, %s3503_s27 }
 0xbbe   : > { %p2884_p1 = scmp.lt.u32.totalorder %s2882_s14, %s2878_s13  ;;  %p2886_p4 = scmp.lt.u32.totalorder %s2878_s13, %s3415_s18 }
 0xbbf   : > { %p2880_p12 = pnand %p2879_p11, %p3068_p3 }
 0xbc0   : > { %p2885_p2 = por %p2884_p1, %p2883_p0 }
 0xbc1   : > { %p2881_p13 = pneg %p2880_p12 }
 0xbc2   : > { %p2887_p5 = por %p2886_p4, %p2885_p2 }
 0xbc4   : > { %p2888_p6 = pnand %p2887_p5, %p2881_p13 }
 0xbc6   : > { %2891 = shalt.err (!%p2888_p6)
}
 0xbc7   : > { %2678 = dma.vmem_to_hbm [thread:$0]  (%p3068_p3), %s2293_s29, 16, %s3415_s18, %s2280_s24  }
 0xbc8 PF: > { %s3505_s20 = sld [smem:[#allocation11_spill]]  ;;  %s3506_s21 = sld [smem:[#allocation7_spill]] }
 0xbce   : > { %p2684_p7 = scmp.ge.s32.totalorder %s3505_s20, 2  ;;  %s2304_s26 = sand.u32 1, %s3506_s21  }
 0xbcf   : > { %s2305_s28 = scalar_lea.sflag [#allocation5], %s2304_s26 }
 0xbd0   : > { %p2681_p8 = pnand %p2684_p7, %p3078_p9 }
 0xbd2   : > { %2925 = dma.done.wait (!%p2681_p8), %s2305_s28, 16  }
 0xbd3   : > { %2927 = vsyncadd (!%p2681_p8), %s2305_s28, 4294967280  ;;  %s22_s16 = sadd.s32 1, %s3505_s20   ;;  %s3508_s17 = sld [smem:[#allocation8_spill]] }
 0xbd4   : > { %p19_p10 = scmp.ge.s32.totalorder %s22_s16, 6   ;;  %s3509_s11 = sld [smem:[#allocation16_spill]] }
 0xbd5   : > { %s3510_s12 = sld [smem:[#allocation9_spill]]  ;;  %s3511_s13 = sld [smem:[#allocation10_spill]] }
 0xbd6   : > { %s3512_s14 = sld [smem:[#allocation12_spill]]  ;;  %s3513_s15 = sld [smem:[#allocation14_spill]] }
 0xbd7   : > { %s3514_s30 = smov %s2934_s10  ;;  %21 = sbr.rel (!%p19_p10) target bundleno = 8 (0x8), region = 117 }
 0xbd9   : > { %s3515_s10 = smov %s3508_s17 }
 0xbde   :  { %2309 = vsyncpa [#allocation5], 1 }
 0xbdf   :  { %2311 = vsyncpa [#allocation5 + $0x1], 1 }

</bundles_post_ra>
